<compile_context>
chip_gen: v7x
topology: tpu7x:2x2x1
jax: 0.10.0
libtpu: 0.0.40
codegen_flags: <defaults>
</compile_context>

<pallas_src>
import functools

import numpy as np
import jax
import jax.numpy as jnp
from jax.experimental import pallas as pl
from jax.experimental.pallas import tpu as pltpu


# ----------------------------------------------------------------------------- kernel

def _fused_driftnet_kernel(
    z_ref, t_ref, e_ref, et_ref, c_ref,
    w1m_ref, b1m_ref, w2m_ref, b2m_ref, w3m_ref, b3m_ref,
    w1u_ref, b1u_ref, w2u_ref, b2u_ref, w3u_ref, b3u_ref, w4u_ref, b4u_ref,
    o_ref,
    *, dim_z_macro, radius):
    f32 = jnp.float32
    M = dim_z_macro
    n_taps = 2 * radius + 1

    z = z_ref[...]                         # (B, M + dmic)
    dmic = z.shape[1] - M
    z_macro = z[:, :M]                     # (B, M)
    z_micro = z[:, M:]                     # (B, dmic)

    # ---------------- macro branch: fcnet_macro applied at every macro position ------
    # Row-expand z to (B*M, M+dmic): row p = b*M + i holds z[b, :].
    zrep = jnp.dot(e_ref[...], z, preferred_element_type=f32)     # (B*M, M+dmic)
    zrep_macro = zrep[:, :M]                                       # (B*M, M)
    zrep_micro = zrep[:, M:]                                       # (B*M, dmic)

    w1m = w1m_ref[...]                                             # (n_taps + dmic, 128)

    # First macro layer, decomposed so the periodic gather never materializes a 3-D
    # tensor: tap k contributes z_macro[b, (i + k - radius) % M] * W1[k, :].
    taps = None
    for k in range(n_taps):
        # one-hot lane selection (constant matrix) + lane reduction -> (B*M, 1)
        sel = jnp.sum(zrep_macro * c_ref[k], axis=1, keepdims=True)
        contrib = sel * w1m[k:k + 1, :]                            # (B*M, 128)
        taps = contrib if taps is None else taps + contrib

    h = (taps
         + jnp.dot(zrep_micro, w1m[n_taps:, :], preferred_element_type=f32)
         + b1m_ref[...])
    h = jnp.maximum(h, 0.0)
    h = jnp.dot(h, w2m_ref[...], preferred_element_type=f32) + b2m_ref[...]
    h = jnp.maximum(h, 0.0)
    macro_out = jnp.dot(h, w3m_ref[...], preferred_element_type=f32) + b3m_ref[...]  # (B*M, 1)

    # Fold (B*M, 1) back to (B, M): out[b, i] = macro_out[b*M + i, 0]
    pos_onehot = c_ref[radius]                                     # (B*M, M), one-hot of i = p % M
    dzdt_macro = jnp.dot(et_ref[...], macro_out * pos_onehot,
                         preferred_element_type=f32)               # (B, M)

    # ---------------- micro branch: fcnet_micro ---------------------------------------
    # micro_in = [z_micro, z_macro, sin(t), cos(t)]; the concat is folded into the first
    # matmul by slicing the weight rows (no in-kernel concatenate needed).
    t = t_ref[...]                                                 # (B, 1)
    w1u = w1u_ref[...]                                             # (dmic + M + 2, 128)
    h = (jnp.dot(z_micro, w1u[:dmic, :], preferred_element_type=f32)
         + jnp.dot(z_macro, w1u[dmic:dmic + M, :], preferred_element_type=f32)
         + jnp.sin(t) * w1u[dmic + M:dmic + M + 1, :]
         + jnp.cos(t) * w1u[dmic + M + 1:dmic + M + 2, :]
         + b1u_ref[...])
    h = jnp.maximum(h, 0.0)
    h = jnp.dot(h, w2u_ref[...], preferred_element_type=f32) + b2u_ref[...]
    h = jnp.maximum(h, 0.0)
    h = jnp.dot(h, w3u_ref[...], preferred_element_type=f32) + b3u_ref[...]
    h = jnp.maximum(h, 0.0)
    dzdt_micro = jnp.dot(h, w4u_ref[...], preferred_element_type=f32) + b4u_ref[...]  # (B, dmic)

    # ---------------- final concat written directly into the output -------------------
    o_ref[:, :M] = dzdt_macro.astype(o_ref.dtype)
    o_ref[:, M:] = dzdt_micro.astype(o_ref.dtype)


# ----------------------------------------------------------------------------- wrapper

def _build_constants(n_batch, dim_z_macro, radius):
    """Tiny constant 0/1 matrices (built at trace time; baked in as XLA constants)."""
    M = dim_z_macro
    P = n_batch * M
    n_taps = 2 * radius + 1

    # Row-replication matrix: (E @ z)[p, :] = z[p // M, :]
    e = np.zeros((P, n_batch), np.float32)
    e[np.arange(P), np.arange(P) // M] = 1.0

    # Per-tap one-hot lane selectors: C[k, p, j] = 1 iff j == (p % M + k - radius) % M.
    # (k == radius is also the position one-hot used for the output fold.)
    c = np.zeros((n_taps, P, M), np.float32)
    p = np.arange(P)
    for k in range(n_taps):
        c[k, p, (p % M + k - radius) % M] = 1.0

    return jnp.asarray(e), jnp.asarray(e.T), jnp.asarray(c)


@functools.partial(jax.jit, static_argnames=("dim_z_macro", "dim_z_micro", "radius"))
def driftnet_forward(params, mu, t, z, f, *, dim_z_macro, dim_z_micro, radius=2):
    # mu, f are accepted for signature parity with the PyTorch module but unused
    # in its forward pass.
    del mu, f
    n_batch, dim_z = z.shape
    assert dim_z == dim_z_macro + dim_z_micro

    e, et, c = _build_constants(n_batch, dim_z_macro, radius)

    args = [z, t, e, et, c]
    for w, b in params["macro"]:
        args += [w, b.reshape(1, -1)]
    for w, b in params["micro"]:
        args += [w, b.reshape(1, -1)]

    kernel = functools.partial(_fused_driftnet_kernel,
                               dim_z_macro=dim_z_macro, radius=radius)
    vmem = pl.BlockSpec(memory_space=pltpu.MemorySpace.VMEM)
    return pl.pallas_call(
        kernel,
        out_shape=jax.ShapeDtypeStruct((n_batch, dim_z), jnp.float32),
        in_specs=[vmem] * len(args),
        out_specs=vmem,
    )(*args)


# ----------------------------------------------------------------------------- parameters

def _xavier_normal(key, fan_in, fan_out):
    std = (2.0 / (fan_in + fan_out)) ** 0.5
    return (std * jax.random.normal(key, (fan_in, fan_out))).astype(jnp.float32)


def init_driftnet_params(key, dim_z_macro, dim_z_micro, radius=2):
    macro_dims = [2 * radius + 1 + dim_z_micro, 128, 128, 1]
    micro_dims = [dim_z_macro + dim_z_micro + 2, 128, 512, 128, dim_z_micro]
    n_macro = len(macro_dims) - 1
    n_micro = len(micro_dims) - 1
    keys = jax.random.split(key, n_macro + n_micro)
    macro_params = [
        (_xavier_normal(keys[i], macro_dims[i], macro_dims[i + 1]),
         jnp.zeros((macro_dims[i + 1],), jnp.float32))
        for i in range(n_macro)
    ]
    micro_params = [
        (_xavier_normal(keys[n_macro + i], micro_dims[i], micro_dims[i + 1]),
         jnp.zeros((micro_dims[i + 1],), jnp.float32))
        for i in range(n_micro)
    ]
    return {"macro": macro_params, "micro": micro_params}


# ----------------------------------------------------------------------------- pure-JAX reference

def _mlp_ref(x, params):
    h = x
    for i, (w, b) in enumerate(params):
        h = h @ w + b
        if i < len(params) - 1:
            h = jnp.maximum(h, 0.0)
    return h


def driftnet_forward_ref(params, mu, t, z, f, *, dim_z_macro, dim_z_micro, radius=2):
    del mu, f
    n_batch = z.shape[0]
    z_macro = z[:, :dim_z_macro]
    z_micro = z[:, dim_z_macro:]
    idx = jnp.arange(dim_z_macro)
    cols = [z_macro[:, (idx + r) % dim_z_macro] for r in range(-radius, radius + 1)]
    z_macro_stack = jnp.stack(cols, axis=-1)
    z_micro_stack = jnp.broadcast_to(
        z_micro[:, None, :], (n_batch, dim_z_macro, dim_z_micro))
    macro_in = jnp.concatenate([z_macro_stack, z_micro_stack], axis=-1)
    dzdt_macro = _mlp_ref(
        macro_in.reshape(-1, macro_in.shape[-1]), params["macro"]
    ).reshape(n_batch, dim_z_macro)
    micro_in = jnp.concatenate([z_micro, z_macro, jnp.sin(t), jnp.cos(t)], axis=-1)
    dzdt_micro = _mlp_ref(micro_in, params["micro"])
    return jnp.concatenate([dzdt_macro, dzdt_micro], axis=-1)


# ----------------------------------------------------------------------------- main

if __name__ == "__main__":
    dim_x = 16
    dim_z_macro = 16
    dim_z_micro = 8
    dim_z = dim_z_macro + dim_z_micro
    n_batch = 2

    root = jax.random.PRNGKey(0)
    k_param, k_mu, k_t, k_z, k_f = jax.random.split(root, 5)

    params = init_driftnet_params(k_param, dim_z_macro, dim_z_micro)

    mu = jax.random.normal(k_mu, (n_batch, dim_x), dtype=jnp.float32)
    t = jax.random.normal(k_t, (n_batch, 1), dtype=jnp.float32)
    z = jax.random.normal(k_z, (n_batch, dim_z), dtype=jnp.float32)
    f = jax.random.normal(k_f, (n_batch, dim_z_micro), dtype=jnp.float32)

    out = driftnet_forward(params, mu, t, z, f,
                           dim_z_macro=dim_z_macro, dim_z_micro=dim_z_micro)
    out = jax.block_until_ready(out)

    ref = driftnet_forward_ref(params, mu, t, z, f,
                               dim_z_macro=dim_z_macro, dim_z_micro=dim_z_micro)
    assert out.shape == (n_batch, dim_z)
    assert jnp.allclose(out, ref, atol=2e-4, rtol=2e-4)

    print("KERNEL_OK")
</pallas_src>

<mosaic_0001>
module attributes {stable_mosaic.version = 11 : i64} {
  func.func @_fused_driftnet_kernel(%arg0: memref<2x24xf32, #tpu.memory_space<vmem>>, %arg1: memref<2x1xf32, #tpu.memory_space<vmem>>, %arg2: memref<32x2xf32, #tpu.memory_space<vmem>>, %arg3: memref<2x32xf32, #tpu.memory_space<vmem>>, %arg4: memref<5x32x16xf32, #tpu.memory_space<vmem>>, %arg5: memref<13x128xf32, #tpu.memory_space<vmem>>, %arg6: memref<1x128xf32, #tpu.memory_space<vmem>>, %arg7: memref<128x128xf32, #tpu.memory_space<vmem>>, %arg8: memref<1x128xf32, #tpu.memory_space<vmem>>, %arg9: memref<128x1xf32, #tpu.memory_space<vmem>>, %arg10: memref<1x1xf32, #tpu.memory_space<vmem>>, %arg11: memref<26x128xf32, #tpu.memory_space<vmem>>, %arg12: memref<1x128xf32, #tpu.memory_space<vmem>>, %arg13: memref<128x512xf32, #tpu.memory_space<vmem>>, %arg14: memref<1x512xf32, #tpu.memory_space<vmem>>, %arg15: memref<512x128xf32, #tpu.memory_space<vmem>>, %arg16: memref<1x128xf32, #tpu.memory_space<vmem>>, %arg17: memref<128x8xf32, #tpu.memory_space<vmem>>, %arg18: memref<1x8xf32, #tpu.memory_space<vmem>>, %arg19: memref<2x24xf32, #tpu.memory_space<vmem>>) attributes {dimension_semantics = [], scalar_prefetch = 0 : i64, scratch_operands = 0 : i64, tpu.core_type = #tpu.core_type<tc>} {
    %c0 = arith.constant 0 : index
    %c0_0 = arith.constant 0 : index
    %0 = vector.load %arg0[%c0, %c0_0] : memref<2x24xf32, #tpu.memory_space<vmem>>, vector<2x24xf32>
    %1 = vector.extract_strided_slice %0 {offsets = [0, 0], sizes = [2, 16], strides = [1, 1]} : vector<2x24xf32> to vector<2x16xf32>
    %2 = vector.extract_strided_slice %0 {offsets = [0, 16], sizes = [2, 8], strides = [1, 1]} : vector<2x24xf32> to vector<2x8xf32>
    %c0_1 = arith.constant 0 : index
    %c0_2 = arith.constant 0 : index
    %3 = vector.load %arg2[%c0_1, %c0_2] : memref<32x2xf32, #tpu.memory_space<vmem>>, vector<32x2xf32>
    %cst = arith.constant dense<0.000000e+00> : vector<32x24xf32>
    %4 = tpu.matmul %3, %0, %cst {dimension_numbers = #tpu.dot_dimension_numbers<[1], [0], [0], [1], [0, 0, 1, 1], [], []>} : vector<32x2xf32>, vector<2x24xf32>, vector<32x24xf32> -> vector<32x24xf32>
    %5 = vector.extract_strided_slice %4 {offsets = [0, 0], sizes = [32, 16], strides = [1, 1]} : vector<32x24xf32> to vector<32x16xf32>
    %6 = vector.extract_strided_slice %4 {offsets = [0, 16], sizes = [32, 8], strides = [1, 1]} : vector<32x24xf32> to vector<32x8xf32>
    %c0_3 = arith.constant 0 : index
    %c0_4 = arith.constant 0 : index
    %7 = vector.load %arg5[%c0_3, %c0_4] : memref<13x128xf32, #tpu.memory_space<vmem>>, vector<13x128xf32>
    %c0_5 = arith.constant 0 : index
    %c0_6 = arith.constant 0 : index
    %c0_7 = arith.constant 0 : index
    %8 = vector.load %arg4[%c0_5, %c0_6, %c0_7] : memref<5x32x16xf32, #tpu.memory_space<vmem>>, vector<1x32x16xf32>
    %9 = vector.shape_cast %8 : vector<1x32x16xf32> to vector<32x16xf32>
    %10 = arith.mulf %5, %9 : vector<32x16xf32>
    %cst_8 = arith.constant dense<0.000000e+00> : vector<32xf32>
    %11 = vector.multi_reduction <add>, %10, %cst_8 [1] : vector<32x16xf32> to vector<32xf32>
    %12 = vector.shape_cast %11 : vector<32xf32> to vector<32x1xf32>
    %13 = vector.extract_strided_slice %7 {offsets = [0, 0], sizes = [1, 128], strides = [1, 1]} : vector<13x128xf32> to vector<1x128xf32>
    %14 = vector.broadcast %12 : vector<32x1xf32> to vector<32x128xf32>
    %15 = vector.broadcast %13 : vector<1x128xf32> to vector<32x128xf32>
    %16 = arith.mulf %14, %15 : vector<32x128xf32>
    %c1 = arith.constant 1 : index
    %c0_9 = arith.constant 0 : index
    %c0_10 = arith.constant 0 : index
    %17 = vector.load %arg4[%c1, %c0_9, %c0_10] : memref<5x32x16xf32, #tpu.memory_space<vmem>>, vector<1x32x16xf32>
    %18 = vector.shape_cast %17 : vector<1x32x16xf32> to vector<32x16xf32>
    %19 = arith.mulf %5, %18 : vector<32x16xf32>
    %cst_11 = arith.constant dense<0.000000e+00> : vector<32xf32>
    %20 = vector.multi_reduction <add>, %19, %cst_11 [1] : vector<32x16xf32> to vector<32xf32>
    %21 = vector.shape_cast %20 : vector<32xf32> to vector<32x1xf32>
    %22 = vector.extract_strided_slice %7 {offsets = [1, 0], sizes = [1, 128], strides = [1, 1]} : vector<13x128xf32> to vector<1x128xf32>
    %23 = vector.broadcast %21 : vector<32x1xf32> to vector<32x128xf32>
    %24 = vector.broadcast %22 : vector<1x128xf32> to vector<32x128xf32>
    %25 = arith.mulf %23, %24 : vector<32x128xf32>
    %26 = arith.addf %16, %25 : vector<32x128xf32>
    %c2 = arith.constant 2 : index
    %c0_12 = arith.constant 0 : index
    %c0_13 = arith.constant 0 : index
    %27 = vector.load %arg4[%c2, %c0_12, %c0_13] : memref<5x32x16xf32, #tpu.memory_space<vmem>>, vector<1x32x16xf32>
    %28 = vector.shape_cast %27 : vector<1x32x16xf32> to vector<32x16xf32>
    %29 = arith.mulf %5, %28 : vector<32x16xf32>
    %cst_14 = arith.constant dense<0.000000e+00> : vector<32xf32>
    %30 = vector.multi_reduction <add>, %29, %cst_14 [1] : vector<32x16xf32> to vector<32xf32>
    %31 = vector.shape_cast %30 : vector<32xf32> to vector<32x1xf32>
    %32 = vector.extract_strided_slice %7 {offsets = [2, 0], sizes = [1, 128], strides = [1, 1]} : vector<13x128xf32> to vector<1x128xf32>
    %33 = vector.broadcast %31 : vector<32x1xf32> to vector<32x128xf32>
    %34 = vector.broadcast %32 : vector<1x128xf32> to vector<32x128xf32>
    %35 = arith.mulf %33, %34 : vector<32x128xf32>
    %36 = arith.addf %26, %35 : vector<32x128xf32>
    %c3 = arith.constant 3 : index
    %c0_15 = arith.constant 0 : index
    %c0_16 = arith.constant 0 : index
    %37 = vector.load %arg4[%c3, %c0_15, %c0_16] : memref<5x32x16xf32, #tpu.memory_space<vmem>>, vector<1x32x16xf32>
    %38 = vector.shape_cast %37 : vector<1x32x16xf32> to vector<32x16xf32>
    %39 = arith.mulf %5, %38 : vector<32x16xf32>
    %cst_17 = arith.constant dense<0.000000e+00> : vector<32xf32>
    %40 = vector.multi_reduction <add>, %39, %cst_17 [1] : vector<32x16xf32> to vector<32xf32>
    %41 = vector.shape_cast %40 : vector<32xf32> to vector<32x1xf32>
    %42 = vector.extract_strided_slice %7 {offsets = [3, 0], sizes = [1, 128], strides = [1, 1]} : vector<13x128xf32> to vector<1x128xf32>
    %43 = vector.broadcast %41 : vector<32x1xf32> to vector<32x128xf32>
    %44 = vector.broadcast %42 : vector<1x128xf32> to vector<32x128xf32>
    %45 = arith.mulf %43, %44 : vector<32x128xf32>
    %46 = arith.addf %36, %45 : vector<32x128xf32>
    %c4 = arith.constant 4 : index
    %c0_18 = arith.constant 0 : index
    %c0_19 = arith.constant 0 : index
    %47 = vector.load %arg4[%c4, %c0_18, %c0_19] : memref<5x32x16xf32, #tpu.memory_space<vmem>>, vector<1x32x16xf32>
    %48 = vector.shape_cast %47 : vector<1x32x16xf32> to vector<32x16xf32>
    %49 = arith.mulf %5, %48 : vector<32x16xf32>
    %cst_20 = arith.constant dense<0.000000e+00> : vector<32xf32>
    %50 = vector.multi_reduction <add>, %49, %cst_20 [1] : vector<32x16xf32> to vector<32xf32>
    %51 = vector.shape_cast %50 : vector<32xf32> to vector<32x1xf32>
    %52 = vector.extract_strided_slice %7 {offsets = [4, 0], sizes = [1, 128], strides = [1, 1]} : vector<13x128xf32> to vector<1x128xf32>
    %53 = vector.broadcast %51 : vector<32x1xf32> to vector<32x128xf32>
    %54 = vector.broadcast %52 : vector<1x128xf32> to vector<32x128xf32>
    %55 = arith.mulf %53, %54 : vector<32x128xf32>
    %56 = arith.addf %46, %55 : vector<32x128xf32>
    %57 = vector.extract_strided_slice %7 {offsets = [5, 0], sizes = [8, 128], strides = [1, 1]} : vector<13x128xf32> to vector<8x128xf32>
    %cst_21 = arith.constant dense<0.000000e+00> : vector<32x128xf32>
    %58 = tpu.matmul %6, %57, %cst_21 {dimension_numbers = #tpu.dot_dimension_numbers<[1], [0], [0], [1], [0, 0, 1, 1], [], []>} : vector<32x8xf32>, vector<8x128xf32>, vector<32x128xf32> -> vector<32x128xf32>
    %59 = arith.addf %56, %58 : vector<32x128xf32>
    %c0_22 = arith.constant 0 : index
    %c0_23 = arith.constant 0 : index
    %60 = vector.load %arg6[%c0_22, %c0_23] : memref<1x128xf32, #tpu.memory_space<vmem>>, vector<1x128xf32>
    %61 = vector.broadcast %60 : vector<1x128xf32> to vector<32x128xf32>
    %62 = arith.addf %59, %61 : vector<32x128xf32>
    %cst_24 = arith.constant 0.000000e+00 : f32
    %63 = vector.broadcast %cst_24 : f32 to vector<32x128xf32>
    %64 = arith.maximumf %62, %63 : vector<32x128xf32>
    %c0_25 = arith.constant 0 : index
    %c0_26 = arith.constant 0 : index
    %65 = vector.load %arg7[%c0_25, %c0_26] : memref<128x128xf32, #tpu.memory_space<vmem>>, vector<128x128xf32>
    %cst_27 = arith.constant dense<0.000000e+00> : vector<32x128xf32>
    %66 = tpu.matmul %64, %65, %cst_27 {dimension_numbers = #tpu.dot_dimension_numbers<[1], [0], [0], [1], [0, 0, 1, 1], [], []>} : vector<32x128xf32>, vector<128x128xf32>, vector<32x128xf32> -> vector<32x128xf32>
    %c0_28 = arith.constant 0 : index
    %c0_29 = arith.constant 0 : index
    %67 = vector.load %arg8[%c0_28, %c0_29] : memref<1x128xf32, #tpu.memory_space<vmem>>, vector<1x128xf32>
    %68 = vector.broadcast %67 : vector<1x128xf32> to vector<32x128xf32>
    %69 = arith.addf %66, %68 : vector<32x128xf32>
    %cst_30 = arith.constant 0.000000e+00 : f32
    %70 = vector.broadcast %cst_30 : f32 to vector<32x128xf32>
    %71 = arith.maximumf %69, %70 : vector<32x128xf32>
    %c0_31 = arith.constant 0 : index
    %c0_32 = arith.constant 0 : index
    %72 = vector.load %arg9[%c0_31, %c0_32] : memref<128x1xf32, #tpu.memory_space<vmem>>, vector<128x1xf32>
    %cst_33 = arith.constant dense<0.000000e+00> : vector<32x1xf32>
    %73 = tpu.matmul %71, %72, %cst_33 {dimension_numbers = #tpu.dot_dimension_numbers<[1], [0], [0], [1], [0, 0, 1, 1], [], []>} : vector<32x128xf32>, vector<128x1xf32>, vector<32x1xf32> -> vector<32x1xf32>
    %c0_34 = arith.constant 0 : index
    %c0_35 = arith.constant 0 : index
    %74 = vector.load %arg10[%c0_34, %c0_35] : memref<1x1xf32, #tpu.memory_space<vmem>>, vector<1x1xf32>
    %75 = vector.broadcast %74 : vector<1x1xf32> to vector<32x1xf32>
    %76 = arith.addf %73, %75 : vector<32x1xf32>
    %c2_36 = arith.constant 2 : index
    %c0_37 = arith.constant 0 : index
    %c0_38 = arith.constant 0 : index
    %77 = vector.load %arg4[%c2_36, %c0_37, %c0_38] : memref<5x32x16xf32, #tpu.memory_space<vmem>>, vector<1x32x16xf32>
    %78 = vector.shape_cast %77 : vector<1x32x16xf32> to vector<32x16xf32>
    %c0_39 = arith.constant 0 : index
    %c0_40 = arith.constant 0 : index
    %79 = vector.load %arg3[%c0_39, %c0_40] : memref<2x32xf32, #tpu.memory_space<vmem>>, vector<2x32xf32>
    %80 = vector.broadcast %76 : vector<32x1xf32> to vector<32x16xf32>
    %81 = arith.mulf %80, %78 : vector<32x16xf32>
    %cst_41 = arith.constant dense<0.000000e+00> : vector<2x16xf32>
    %82 = tpu.matmul %79, %81, %cst_41 {dimension_numbers = #tpu.dot_dimension_numbers<[1], [0], [0], [1], [0, 0, 1, 1], [], []>} : vector<2x32xf32>, vector<32x16xf32>, vector<2x16xf32> -> vector<2x16xf32>
    %c0_42 = arith.constant 0 : index
    %c0_43 = arith.constant 0 : index
    %83 = vector.load %arg1[%c0_42, %c0_43] : memref<2x1xf32, #tpu.memory_space<vmem>>, vector<2x1xf32>
    %c0_44 = arith.constant 0 : index
    %c0_45 = arith.constant 0 : index
    %84 = vector.load %arg11[%c0_44, %c0_45] : memref<26x128xf32, #tpu.memory_space<vmem>>, vector<26x128xf32>
    %85 = vector.extract_strided_slice %84 {offsets = [0, 0], sizes = [8, 128], strides = [1, 1]} : vector<26x128xf32> to vector<8x128xf32>
    %cst_46 = arith.constant dense<0.000000e+00> : vector<2x128xf32>
    %86 = tpu.matmul %2, %85, %cst_46 {dimension_numbers = #tpu.dot_dimension_numbers<[1], [0], [0], [1], [0, 0, 1, 1], [], []>} : vector<2x8xf32>, vector<8x128xf32>, vector<2x128xf32> -> vector<2x128xf32>
    %87 = vector.extract_strided_slice %84 {offsets = [8, 0], sizes = [16, 128], strides = [1, 1]} : vector<26x128xf32> to vector<16x128xf32>
    %cst_47 = arith.constant dense<0.000000e+00> : vector<2x128xf32>
    %88 = tpu.matmul %1, %87, %cst_47 {dimension_numbers = #tpu.dot_dimension_numbers<[1], [0], [0], [1], [0, 0, 1, 1], [], []>} : vector<2x16xf32>, vector<16x128xf32>, vector<2x128xf32> -> vector<2x128xf32>
    %89 = arith.addf %86, %88 : vector<2x128xf32>
    %90 = math.sin %83 : vector<2x1xf32>
    %91 = vector.extract_strided_slice %84 {offsets = [24, 0], sizes = [1, 128], strides = [1, 1]} : vector<26x128xf32> to vector<1x128xf32>
    %92 = vector.broadcast %90 : vector<2x1xf32> to vector<2x128xf32>
    %93 = vector.broadcast %91 : vector<1x128xf32> to vector<2x128xf32>
    %94 = arith.mulf %92, %93 : vector<2x128xf32>
    %95 = arith.addf %89, %94 : vector<2x128xf32>
    %96 = math.cos %83 : vector<2x1xf32>
    %97 = vector.extract_strided_slice %84 {offsets = [25, 0], sizes = [1, 128], strides = [1, 1]} : vector<26x128xf32> to vector<1x128xf32>
    %98 = vector.broadcast %96 : vector<2x1xf32> to vector<2x128xf32>
    %99 = vector.broadcast %97 : vector<1x128xf32> to vector<2x128xf32>
    %100 = arith.mulf %98, %99 : vector<2x128xf32>
    %101 = arith.addf %95, %100 : vector<2x128xf32>
    %c0_48 = arith.constant 0 : index
    %c0_49 = arith.constant 0 : index
    %102 = vector.load %arg12[%c0_48, %c0_49] : memref<1x128xf32, #tpu.memory_space<vmem>>, vector<1x128xf32>
    %103 = vector.broadcast %102 : vector<1x128xf32> to vector<2x128xf32>
    %104 = arith.addf %101, %103 : vector<2x128xf32>
    %cst_50 = arith.constant 0.000000e+00 : f32
    %105 = vector.broadcast %cst_50 : f32 to vector<2x128xf32>
    %106 = arith.maximumf %104, %105 : vector<2x128xf32>
    %c0_51 = arith.constant 0 : index
    %c0_52 = arith.constant 0 : index
    %107 = vector.load %arg13[%c0_51, %c0_52] : memref<128x512xf32, #tpu.memory_space<vmem>>, vector<128x512xf32>
    %cst_53 = arith.constant dense<0.000000e+00> : vector<2x512xf32>
    %108 = tpu.matmul %106, %107, %cst_53 {dimension_numbers = #tpu.dot_dimension_numbers<[1], [0], [0], [1], [0, 0, 1, 1], [], []>} : vector<2x128xf32>, vector<128x512xf32>, vector<2x512xf32> -> vector<2x512xf32>
    %c0_54 = arith.constant 0 : index
    %c0_55 = arith.constant 0 : index
    %109 = vector.load %arg14[%c0_54, %c0_55] : memref<1x512xf32, #tpu.memory_space<vmem>>, vector<1x512xf32>
    %110 = vector.broadcast %109 : vector<1x512xf32> to vector<2x512xf32>
    %111 = arith.addf %108, %110 : vector<2x512xf32>
    %cst_56 = arith.constant 0.000000e+00 : f32
    %112 = vector.broadcast %cst_56 : f32 to vector<2x512xf32>
    %113 = arith.maximumf %111, %112 : vector<2x512xf32>
    %c0_57 = arith.constant 0 : index
    %c0_58 = arith.constant 0 : index
    %114 = vector.load %arg15[%c0_57, %c0_58] : memref<512x128xf32, #tpu.memory_space<vmem>>, vector<512x128xf32>
    %cst_59 = arith.constant dense<0.000000e+00> : vector<2x128xf32>
    %115 = tpu.matmul %113, %114, %cst_59 {dimension_numbers = #tpu.dot_dimension_numbers<[1], [0], [0], [1], [0, 0, 1, 1], [], []>} : vector<2x512xf32>, vector<512x128xf32>, vector<2x128xf32> -> vector<2x128xf32>
    %c0_60 = arith.constant 0 : index
    %c0_61 = arith.constant 0 : index
    %116 = vector.load %arg16[%c0_60, %c0_61] : memref<1x128xf32, #tpu.memory_space<vmem>>, vector<1x128xf32>
    %117 = vector.broadcast %116 : vector<1x128xf32> to vector<2x128xf32>
    %118 = arith.addf %115, %117 : vector<2x128xf32>
    %cst_62 = arith.constant 0.000000e+00 : f32
    %119 = vector.broadcast %cst_62 : f32 to vector<2x128xf32>
    %120 = arith.maximumf %118, %119 : vector<2x128xf32>
    %c0_63 = arith.constant 0 : index
    %c0_64 = arith.constant 0 : index
    %121 = vector.load %arg17[%c0_63, %c0_64] : memref<128x8xf32, #tpu.memory_space<vmem>>, vector<128x8xf32>
    %cst_65 = arith.constant dense<0.000000e+00> : vector<2x8xf32>
    %122 = tpu.matmul %120, %121, %cst_65 {dimension_numbers = #tpu.dot_dimension_numbers<[1], [0], [0], [1], [0, 0, 1, 1], [], []>} : vector<2x128xf32>, vector<128x8xf32>, vector<2x8xf32> -> vector<2x8xf32>
    %c0_66 = arith.constant 0 : index
    %c0_67 = arith.constant 0 : index
    %123 = vector.load %arg18[%c0_66, %c0_67] : memref<1x8xf32, #tpu.memory_space<vmem>>, vector<1x8xf32>
    %124 = vector.broadcast %123 : vector<1x8xf32> to vector<2x8xf32>
    %125 = arith.addf %122, %124 : vector<2x8xf32>
    %c0_68 = arith.constant 0 : index
    %c0_69 = arith.constant 0 : index
    %126 = vector.load %arg19[%c0_68, %c0_69] : memref<2x24xf32, #tpu.memory_space<vmem>>, vector<2x16xf32>
    tpu.vector_store %arg19[%c0_68, %c0_69], %82 {strides = array<i32>} : memref<2x24xf32, #tpu.memory_space<vmem>>, vector<2x16xf32>,
    %c0_70 = arith.constant 0 : index
    %c16 = arith.constant 16 : index
    %127 = vector.load %arg19[%c0_70, %c16] : memref<2x24xf32, #tpu.memory_space<vmem>>, vector<2x8xf32>
    tpu.vector_store %arg19[%c0_70, %c16], %125 {strides = array<i32>} : memref<2x24xf32, #tpu.memory_space<vmem>>, vector<2x8xf32>,
    return
  }
}

</mosaic_0001>

<bundles_post_ra>
// kernel: driftnet_forward.1
= control target key start
LH: loop header
LB: loop body
LE: loop exit
PB: predicated region body
PF: predicated region fallthrough
CT: control target
= control target key end

     0   :  { %s3378_s0 = inlined_call_operand.hbm [shape: f32[2,24], index: 0, kind: input, shape index: {}]   ;;  %s3379_s1 = inlined_call_operand.vmem [shape: f32[2,1], index: 1, kind: input, shape index: {}]   ;;  %s3380_s2 = inlined_call_operand.vmem [shape: f32[32,2], index: 2, kind: input, shape index: {}]   ;;  %s3381_s3 = inlined_call_operand.vmem [shape: f32[2,32], index: 3, kind: input, shape index: {}]   ;;  %s3382_s4 = inlined_call_operand.vmem [shape: f32[5,32,16], index: 4, kind: input, shape index: {}]   ;;  %s3383_s5 = inlined_call_operand.hbm [shape: f32[13,128], index: 5, kind: input, shape index: {}]   ;;  %s3384_s6 = inlined_call_operand.hbm [shape: f32[1,128], index: 6, kind: input, shape index: {}]   ;;  %s3385_s7 = inlined_call_operand.vmem [shape: f32[128,128], index: 7, kind: input, shape index: {}]   ;;  %s3386_s8 = inlined_call_operand.hbm [shape: f32[1,128], index: 8, kind: input, shape index: {}]   ;;  %s3387_s9 = inlined_call_operand.vmem [shape: f32[128,1], index: 9, kind: input, shape index: {}]   ;;  %s3388_s10 = inlined_call_operand.<no memory space> [shape: f32[1,1], index: 10, kind: input, shape index: {}]   ;;  %s3389_s11 = inlined_call_operand.vmem [shape: f32[26,128], index: 11, kind: input, shape index: {}]   ;;  %s3390_s12 = inlined_call_operand.hbm [shape: f32[1,128], index: 12, kind: input, shape index: {}]   ;;  %s3391_s13 = inlined_call_operand.hbm [shape: f32[128,512], index: 13, kind: input, shape index: {}]   ;;  %s3392_s14 = inlined_call_operand.hbm [shape: f32[1,512], index: 14, kind: input, shape index: {}]   ;;  %s3393_s15 = inlined_call_operand.hbm [shape: f32[512,128], index: 15, kind: input, shape index: {}]   ;;  %s3394_s16 = inlined_call_operand.hbm [shape: f32[1,128], index: 16, kind: input, shape index: {}]   ;;  %s3395_s17 = inlined_call_operand.vmem [shape: f32[128,8], index: 17, kind: input, shape index: {}]   ;;  %s3396_s18 = inlined_call_operand.hbm [shape: f32[1,8], index: 18, kind: input, shape index: {}]   ;;  %s3397_s19 = inlined_call_operand.hbm [shape: f32[2,24], index: 19, kind: output, shape index: {}]  }
   0x1   :  { %3400 = sst [smem:[#allocation28_spill]] %s3378_s0  ;;  %v24_v0 = vstv %s3388_s10 }
   0x2   :  { %3401 = sst [smem:[#allocation29_spill]] %s3379_s1  ;;  %25 = vst [vmem:[#allocation2] sm:$0x1] %v24_v0 }
   0x3   :  { %3402 = sst [smem:[#allocation30_spill]] %s3380_s2 }
   0x4   :  { %3403 = sst [smem:[#allocation31_spill]] %s3381_s3 }
   0x5   :  { %26 = vsyncpa [#allocation4], 0 }
   0x6   :  { %27 = vsyncpa [#allocation7], 0 }
   0x7   :  { %28 = vsyncpa [#allocation10], 0 }
   0x8   :  { %29 = vsyncpa [#allocation13], 0 }
   0x9   :  { %30 = vsyncpa [#allocation16], 0 }
   0xa   :  { %31 = vsyncpa [#allocation19], 0 }
   0xb   :  { %32 = vsyncpa [#allocation5], 0  ;;  %s2719_s20 = smov [#allocation6]   ;;  %s2463_s2 = scalar_lea.hbm %s3383_s5, 256 }
   0xc   :  { %s56_s21 = sshll.u32 %s2719_s20, 4  ;;  %p2464_p0 = scmp.ne.s32.totalorder %s3383_s5, %s2463_s2  ;;  %s57_s21 = int_to_ptr.vmem [resolvable:$true] %s56_s21 }
   0xd   :  { %p2467_p1 = scmp.lt.u32.totalorder %s2463_s2, %s3383_s5 }
   0xf   :  { %p2469_p2 = pnand %p2467_p1, %p2464_p0 }
  0x11   :  { %2472 = shalt.err (!%p2469_p2)
}
  0x12   :  { %s2473_s3 = scalar_lea.vmem %s57_s21, 256  ;;  %p2478_p4 = scmp.lt.s32.totalorder %s57_s21, %s57_s21 }
  0x13   :  { %p2474_p3 = scmp.ne.s32.totalorder %s57_s21, %s2473_s3  ;;  %p2479_p5 = scmp.lt.s32.totalorder %s2473_s3, %s2473_s3 }
  0x15   :  { %p2480_p6 = por %p2479_p5, %p2478_p4 }
  0x17   :  { %p2481_p7 = pnand %p2480_p6, %p2474_p3 }
  0x19   :  { %2484 = shalt.err (!%p2481_p7)
}
  0x1a   :  { %s2720_s26 = smov 128   ;;  %s2721_s27 = smov 8  }
  0x1b   :  { %62 = dma.hbm_to_vmem [thread:$0]  %s3383_s5, 256, %s57_s21, [#allocation7], %s2720_s26, %s2720_s26, %s2721_s27  }
  0x1c   :  { %s2722_s0 = smov [#allocation9]   ;;  %s2723_s20 = smov [#allocation12]  }
  0x1d   :  { %s81_s30 = sshll.u32 %s2722_s0, 4  ;;  %s106_s1 = sshll.u32 %s2723_s20, 4  ;;  %s82_s30 = int_to_ptr.vmem [resolvable:$true] %s81_s30  ;;  %s107_s1 = int_to_ptr.vmem [resolvable:$true] %s106_s1 }
  0x1e   :  { %s2485_s23 = scalar_lea.hbm %s3386_s8, 16 }
  0x1f   :  { %p2486_p8 = scmp.ne.s32.totalorder %s3386_s8, %s2485_s23  ;;  %p2489_p9 = scmp.lt.u32.totalorder %s2485_s23, %s3386_s8 }
  0x21   :  { %p2491_p10 = pnand %p2489_p9, %p2486_p8 }
  0x23   :  { %2494 = shalt.err (!%p2491_p10)
}
  0x24   :  { %s2495_s5 = scalar_lea.vmem %s82_s30, 16  ;;  %s2499_s21 = scalar_lea.vmem %s82_s30, 32 }
  0x25   :  { %p2496_p11 = scmp.ne.s32.totalorder %s82_s30, %s2495_s5  ;;  %p2500_p12 = scmp.lt.s32.totalorder %s82_s30, %s82_s30 }
  0x26   :  { %p2501_p13 = scmp.lt.s32.totalorder %s2499_s21, %s2495_s5 }
  0x28   :  { %p2502_p0 = por %p2501_p13, %p2500_p12 }
  0x2a   :  { %p2503_p1 = pnand %p2502_p0, %p2496_p11 }
  0x2c   :  { %2506 = shalt.err (!%p2503_p1)
}
  0x2d   :  { %84 = dma.hbm_to_vmem [thread:$0]  %s3386_s8, 16, %s82_s30, [#allocation10]  }
  0x2e   :  { %s2507_s22 = scalar_lea.hbm %s3391_s13, 8192 }
  0x2f   :  { %p2508_p2 = scmp.ne.s32.totalorder %s3391_s13, %s2507_s22  ;;  %p2511_p3 = scmp.lt.u32.totalorder %s2507_s22, %s3391_s13 }
  0x31   :  { %p2513_p4 = pnand %p2511_p3, %p2508_p2 }
  0x33   :  { %2516 = shalt.err (!%p2513_p4)
}
  0x34   :  { %s2517_s25 = scalar_lea.vmem %s107_s1, 8192  ;;  %p2522_p6 = scmp.lt.s32.totalorder %s107_s1, %s107_s1 }
  0x35   :  { %p2518_p5 = scmp.ne.s32.totalorder %s107_s1, %s2517_s25  ;;  %p2523_p7 = scmp.lt.s32.totalorder %s2517_s25, %s2517_s25 }
  0x37   :  { %p2524_p8 = por %p2523_p7, %p2522_p6 }
  0x39   :  { %p2525_p9 = pnand %p2524_p8, %p2518_p5 }
  0x3b   :  { %2528 = shalt.err (!%p2525_p9)
}
  0x3c   :  { %s2724_s8 = smov 512   ;;  %s2725_s30 = smov 32  }
  0x3d   :  { %112 = dma.hbm_to_vmem [thread:$0]  %s3391_s13, 8192, %s107_s1, [#allocation13], %s2724_s8, %s2724_s8, %s2725_s30  }
  0x3e   :  { %s2726_s21 = smov [#allocation15]   ;;  %s2727_s29 = smov [#allocation3]  }
  0x3f   :  { %s128_s28 = sshll.u32 %s2726_s21, 4  ;;  %s39_s0 = sshll.u32 %s2727_s29, 4  ;;  %s129_s28 = int_to_ptr.vmem [resolvable:$true] %s128_s28  ;;  %s40_s0 = int_to_ptr.vmem [resolvable:$true] %s39_s0 }
  0x40   :  { %s2529_s2 = scalar_lea.hbm %s3393_s15, 8192 }
  0x41   :  { %p2530_p10 = scmp.ne.s32.totalorder %s3393_s15, %s2529_s2  ;;  %p2533_p11 = scmp.lt.u32.totalorder %s2529_s2, %s3393_s15 }
  0x43   :  { %p2535_p12 = pnand %p2533_p11, %p2530_p10 }
  0x45   :  { %2538 = shalt.err (!%p2535_p12)
}
  0x46   :  { %s2539_s13 = scalar_lea.vmem %s129_s28, 8192  ;;  %p2544_p0 = scmp.lt.s32.totalorder %s129_s28, %s129_s28 }
  0x47   :  { %p2540_p13 = scmp.ne.s32.totalorder %s129_s28, %s2539_s13  ;;  %p2545_p1 = scmp.lt.s32.totalorder %s2539_s13, %s2539_s13 }
  0x49   :  { %p2546_p2 = por %p2545_p1, %p2544_p0 }
  0x4b   :  { %p2547_p3 = pnand %p2546_p2, %p2540_p13 }
  0x4d   :  { %2550 = shalt.err (!%p2547_p3)
}
  0x4e   :  { %134 = dma.hbm_to_vmem [thread:$0]  %s3393_s15, 8192, %s129_s28, [#allocation16], %s2720_s26, %s2720_s26, %s2721_s27  }
  0x4f   :  { %s3404_s5 = sld [smem:[#allocation28_spill]] }
  0x55   :  { %s2551_s21 = scalar_lea.hbm %s3404_s5, 32 }
  0x56   :  { %p2552_p4 = scmp.ne.s32.totalorder %s3404_s5, %s2551_s21  ;;  %p2555_p5 = scmp.lt.u32.totalorder %s2551_s21, %s3404_s5 }
  0x58   :  { %p2557_p6 = pnand %p2555_p5, %p2552_p4 }
  0x5a   :  { %2560 = shalt.err (!%p2557_p6)
}
  0x5b   :  { %s2561_s23 = scalar_lea.vmem %s40_s0, 32  ;;  %p2566_p8 = scmp.lt.s32.totalorder %s40_s0, %s40_s0 }
  0x5c   :  { %p2562_p7 = scmp.ne.s32.totalorder %s40_s0, %s2561_s23  ;;  %p2567_p9 = scmp.lt.s32.totalorder %s2561_s23, %s2561_s23 }
  0x5e   :  { %p2568_p10 = por %p2567_p9, %p2566_p8 }
  0x60   :  { %p2569_p11 = pnand %p2568_p10, %p2562_p7 }
  0x62   :  { %2572 = shalt.err (!%p2569_p11)
}
  0x63   :  { %42 = dma.hbm_to_vmem [thread:$0]  %s3404_s5, 32, %s40_s0, [#allocation4]  }
  0x64   :  { %s2728_s27 = smov [#allocation8]   ;;  %s2729_s24 = smov [#allocation11]  }
  0x65   :  { %s69_s28 = sshll.u32 %s2728_s27, 4  ;;  %s97_s10 = sshll.u32 %s2729_s24, 4  ;;  %s70_s28 = int_to_ptr.vmem [resolvable:$true] %s69_s28  ;;  %s98_s10 = int_to_ptr.vmem [resolvable:$true] %s97_s10 }
  0x66   :  { %s2573_s1 = scalar_lea.hbm %s3384_s6, 16 }
  0x67   :  { %p2574_p12 = scmp.ne.s32.totalorder %s3384_s6, %s2573_s1  ;;  %p2577_p13 = scmp.lt.u32.totalorder %s2573_s1, %s3384_s6 }
  0x69   :  { %p2579_p0 = pnand %p2577_p13, %p2574_p12 }
  0x6b   :  { %2582 = shalt.err (!%p2579_p0)
}
  0x6c   :  { %s2583_s0 = scalar_lea.vmem %s70_s28, 16  ;;  %s2587_s5 = scalar_lea.vmem %s70_s28, 32 }
  0x6d   :  { %p2584_p1 = scmp.ne.s32.totalorder %s70_s28, %s2583_s0  ;;  %p2588_p2 = scmp.lt.s32.totalorder %s70_s28, %s70_s28 }
  0x6e   :  { %p2589_p3 = scmp.lt.s32.totalorder %s2587_s5, %s2583_s0 }
  0x70   :  { %p2590_p4 = por %p2589_p3, %p2588_p2 }
  0x72   :  { %p2591_p5 = pnand %p2590_p4, %p2584_p1 }
  0x74   :  { %2594 = shalt.err (!%p2591_p5)
}
  0x75   :  { %72 = dma.hbm_to_vmem [thread:$0]  %s3384_s6, 16, %s70_s28, [#allocation7]  }
  0x76   :  { %s2595_s23 = scalar_lea.hbm %s3390_s12, 16 }
  0x77   :  { %p2596_p6 = scmp.ne.s32.totalorder %s3390_s12, %s2595_s23  ;;  %p2599_p7 = scmp.lt.u32.totalorder %s2595_s23, %s3390_s12 }
  0x79   :  { %p2601_p8 = pnand %p2599_p7, %p2596_p6 }
  0x7b   :  { %2604 = shalt.err (!%p2601_p8)
}
  0x7c   :  { %s2605_s25 = scalar_lea.vmem %s98_s10, 16  ;;  %s2609_s13 = scalar_lea.vmem %s98_s10, 32 }
  0x7d   :  { %p2606_p9 = scmp.ne.s32.totalorder %s98_s10, %s2605_s25  ;;  %p2610_p10 = scmp.lt.s32.totalorder %s98_s10, %s98_s10 }
  0x7e   :  { %p2611_p11 = scmp.lt.s32.totalorder %s2609_s13, %s2605_s25 }
  0x80   :  { %p2612_p12 = por %p2611_p11, %p2610_p10 }
  0x82   :  { %p2613_p13 = pnand %p2612_p12, %p2606_p9 }
  0x84   :  { %2616 = shalt.err (!%p2613_p13)
}
  0x85   :  { %100 = dma.hbm_to_vmem [thread:$0]  %s3390_s12, 16, %s98_s10, [#allocation10]  }
  0x86   :  { %s2730_s1 = smov [#allocation14]   ;;  %s2731_s30 = smov [#allocation17]  }
  0x87   :  { %s119_s8 = sshll.u32 %s2730_s1, 4  ;;  %s141_s3 = sshll.u32 %s2731_s30, 4  ;;  %s120_s8 = int_to_ptr.vmem [resolvable:$true] %s119_s8  ;;  %s142_s3 = int_to_ptr.vmem [resolvable:$true] %s141_s3 }
  0x88   :  { %s2617_s5 = scalar_lea.hbm %s3392_s14, 64 }
  0x89   :  { %p2618_p0 = scmp.ne.s32.totalorder %s3392_s14, %s2617_s5  ;;  %p2621_p1 = scmp.lt.u32.totalorder %s2617_s5, %s3392_s14 }
  0x8b   :  { %p2623_p2 = pnand %p2621_p1, %p2618_p0 }
  0x8d   :  { %2626 = shalt.err (!%p2623_p2)
}
  0x8e   :  { %s2627_s12 = scalar_lea.vmem %s120_s8, 64  ;;  %p2632_p4 = scmp.lt.s32.totalorder %s120_s8, %s120_s8 }
  0x8f   :  { %p2628_p3 = scmp.ne.s32.totalorder %s120_s8, %s2627_s12  ;;  %p2633_p5 = scmp.lt.s32.totalorder %s2627_s12, %s2627_s12 }
  0x91   :  { %p2634_p6 = por %p2633_p5, %p2632_p4 }
  0x93   :  { %p2635_p7 = pnand %p2634_p6, %p2628_p3 }
  0x95   :  { %2638 = shalt.err (!%p2635_p7)
}
  0x96   :  { %122 = dma.hbm_to_vmem [thread:$0]  %s3392_s14, 64, %s120_s8, [#allocation13]  }
  0x97   :  { %s2639_s27 = scalar_lea.hbm %s3394_s16, 16 }
  0x98   :  { %p2640_p8 = scmp.ne.s32.totalorder %s3394_s16, %s2639_s27  ;;  %p2643_p9 = scmp.lt.u32.totalorder %s2639_s27, %s3394_s16 }
  0x9a   :  { %p2645_p10 = pnand %p2643_p9, %p2640_p8 }
  0x9c   :  { %2648 = shalt.err (!%p2645_p10)
}
  0x9d   :  { %s2649_s28 = scalar_lea.vmem %s142_s3, 16  ;;  %s2653_s1 = scalar_lea.vmem %s142_s3, 32 }
  0x9e   :  { %p2650_p11 = scmp.ne.s32.totalorder %s142_s3, %s2649_s28  ;;  %p2654_p12 = scmp.lt.s32.totalorder %s142_s3, %s142_s3 }
  0x9f   :  { %p2655_p13 = scmp.lt.s32.totalorder %s2653_s1, %s2649_s28 }
  0xa1   :  { %p2656_p0 = por %p2655_p13, %p2654_p12 }
  0xa3   :  { %p2657_p1 = pnand %p2656_p0, %p2650_p11 }
  0xa5   :  { %2660 = shalt.err (!%p2657_p1)
}
  0xa6   :  { %144 = dma.hbm_to_vmem [thread:$0]  %s3394_s16, 16, %s142_s3, [#allocation16]  }
  0xa7   :  { %s2732_s30 = smov [#allocation18]   ;;  %s2661_s29 = scalar_lea.hbm %s3396_s18, 16 }
  0xa8   :  { %s153_s21 = sshll.u32 %s2732_s30, 4  ;;  %p2662_p2 = scmp.ne.s32.totalorder %s3396_s18, %s2661_s29  ;;  %s154_s21 = int_to_ptr.vmem [resolvable:$true] %s153_s21 }
  0xa9   :  { %p2665_p3 = scmp.lt.u32.totalorder %s2661_s29, %s3396_s18 }
  0xab   :  { %p2667_p4 = pnand %p2665_p3, %p2662_p2 }
  0xad   :  { %2670 = shalt.err (!%p2667_p4)
}
  0xae   :  { %s2671_s10 = scalar_lea.vmem %s154_s21, 16  ;;  %s2675_s16 = scalar_lea.vmem %s154_s21, 32 }
  0xaf   :  { %p2672_p5 = scmp.ne.s32.totalorder %s154_s21, %s2671_s10  ;;  %p2676_p6 = scmp.lt.s32.totalorder %s154_s21, %s154_s21 }
  0xb0   :  { %p2677_p7 = scmp.lt.s32.totalorder %s2675_s16, %s2671_s10 }
  0xb2   :  { %p2678_p8 = por %p2677_p7, %p2676_p6 }
  0xb4   :  { %p2679_p9 = pnand %p2678_p8, %p2672_p5 }
  0xb6   :  { %2682 = shalt.err (!%p2679_p9)
}
  0xb7   :  { %156 = dma.hbm_to_vmem [thread:$0]  %s3396_s18, 16, %s154_s21, [#allocation19]  }
  0xb8   :  { %2705 = dma.done.wait [#allocation4], 32  }
  0xb9   :  { %2706 = vsyncadd [#allocation4], 4294967264 }
  0xba   :  { %2707 = dma.done.wait [#allocation7], 272  }
  0xbb   :  { %2708 = vsyncadd [#allocation7], 4294967024 }
  0xbc   :  { %2709 = dma.done.wait [#allocation10], 32  }
  0xbd   :  { %2710 = vsyncadd [#allocation10], 4294967264 }
  0xbe   :  { %2711 = dma.done.wait [#allocation13], 8256  }
  0xbf   :  { %2712 = vsyncadd [#allocation13], 4294959040 }
  0xc0   :  { %2713 = dma.done.wait [#allocation16], 8208  }
  0xc1   :  { %2714 = vsyncadd [#allocation16], 4294959088 }
  0xc2   :  { %2715 = dma.done.wait [#allocation19], 16  }
  0xc3   :  { %2716 = vsyncadd [#allocation19], 4294967280  ;;  %vm205_vm0 = vcmask 1041408   ;;  %vm192_vm1 = vcmask 15360   ;;  %v2975_v1 = vld [vmem:[#allocation3] sm:$0x3] }
  0xc4   :  { %s3405_s27 = sld [smem:[#allocation30_spill]]  ;;  %2051 = vmatprep.subr.msk.mxu0 %vm205_vm0, %v2975_v1  ;;  %v2991_v6 = vld [vmem:[#allocation6] sm:$0xff]  ;;  %v295_v7 = vld [vmem:[#allocation6 + $0x8] sm:$0x1f]  ;;  %vm471_vm2 = vcmask 1042432   ;;  %s2733_s1 = smov 112  }
  0xc5   :  { %2052 = vmatpush3.msk.msra.mxu0 %vm205_vm0, %v2975_v1  ;;  %v472_v8 = vrot.slane %v2991_v6, 5  ;;  %v473_v9 = vrot.slane %v295_v7, 5  ;;  %v296_v15 = vld [vmem:[%s3382_s4] sm:$0xff]  ;;  %vm304_vm3 = vcmask 130048   ;;  %v297_v17 = vld [vmem:[%s3382_s4 + $0x8] sm:$0xff]  ;;  %v1870_v38 = vld [vmem:[%s3382_s4 + $0x38] sm:$0xff] }
  0xc6   :  { %v1868_v20 = vld [vmem:[%s3382_s4 + $0x28] sm:$0xff]  ;;  %v1867_v21 = vld [vmem:[%s3382_s4 + $0x20] sm:$0xff]  ;;  %v3055_v44 = vld [vmem:[%s3382_s4 + $0x58] sm:$0xff]  ;;  %vm476_vm4 = vcmask 64512   ;;  %s3406_s5 = sld [smem:[#allocation29_spill]]  ;;  %s3407_s12 = sld [smem:[#allocation31_spill]] }
  0xc7   :  { %v474_v10 = vsel %vm471_vm2, %v472_v8, %v473_v9  ;;  %v3021_v25 = vld [vmem:[%s3382_s4 + $0x48] sm:$0xff]  ;;  %v3026_v26 = vld [vmem:[%s3382_s4 + $0x40] sm:$0xff]  ;;  %v299_v49 = vld [vmem:[%s3382_s4 + $0x18] sm:$0xff] }
  0xc8   :  { %2059 = vmatprep.subr.mxu0 %v474_v10  ;;  %v1876_v31 = vld [vmem:[%s3382_s4 + $0x68] sm:$0xff]  ;;  %v1875_v32 = vld [vmem:[%s3382_s4 + $0x60] sm:$0xff]  ;;  %v298_v50 = vld [vmem:[%s3382_s4 + $0x10] sm:$0xff] }
  0xc9   :  { %v1879_v37 = vld [vmem:[%s3382_s4 + $0x80] sm:$0xff]  ;;  %v1880_v43 = vld [vmem:[%s3382_s4 + $0x88] sm:$0xff]  ;;  %v1869_v55 = vld [vmem:[%s3382_s4 + $0x30] sm:$0xff] }
  0xca   :  { %v188_v2 = vld [vmem:[%s3405_s27] sm:$0xff]  ;;  %v189_v3 = vld [vmem:[%s3405_s27 + $0x8] sm:$0xff]  ;;  %v190_v4 = vld [vmem:[%s3405_s27 + $0x10] sm:$0xff] }
  0xcb   :  { %2053 = vmatprep.mubr.msk.f32.mxu0 %vm192_vm1, %v188_v2  ;;  %v191_v5 = vld [vmem:[%s3405_s27 + $0x18] sm:$0xff]  ;;  %v3077_v56 = vld [vmem:[%s3382_s4 + $0x50] sm:$0xff]  ;;  %s2744_s27 = smov 16  }
  0xcc   :  { %2054 = vmatmul.mubr.msk.f32.vlgmr.msra.gmra.mrb[0].mxu0 %vm192_vm1, %v189_v3  ;;  %v1878_v61 = vld [vmem:[%s3382_s4 + $0x78] sm:$0xff]  ;;  %v1877_v62 = vld [vmem:[%s3382_s4 + $0x70] sm:$0xff] }
  0xcd   :  { %2056 = vmatprep.mubr.msk.f32.mxu0 %vm192_vm1, %v190_v4  ;;  %2060 = vmatpush3.msra.mxu0 %v474_v10  ;;  %v1882_v4 = vld [vmem:[%s3382_s4 + $0x98] sm:$0xff] }
  0xd0   :  { %2057 = vmatmul.mubr.msk.f32.gmra.mrb[2].mxu0 %vm192_vm1, %v191_v5  ;;  %v1881_v5 = vld [vmem:[%s3382_s4 + $0x90] sm:$0xff] }
 0x19f   :  { %v2055_v11 = vpop.f32.mrb[0].mxu0 }
 0x1a0   :  { %v275_v12 = vpop.f32.mrb[1].mxu0  ;;  %v301_v19 = vmul.f32 %v2055_v11, %v297_v17  ;;  %v331_v23 = vmul.f32 %v2055_v11, %v1868_v20  ;;  %v364_v28 = vmul.f32 %v2055_v11, %v3021_v25  ;;  %v397_v34 = vmul.f32 %v2055_v11, %v1876_v31  ;;  %v597_v31 = vld [vmem:[%s3385_s7 + $0x40] sm:$0xff] }
 0x1a1   :  { %461 = vrot.lane.b32.xlu0 %v275_v12, %s2733_s1  ;;  %v300_v16 = vmul.f32 %v296_v15, %v275_v12  ;;  %v330_v24 = vmul.f32 %v1867_v21, %v275_v12  ;;  %v363_v30 = vmul.f32 %v3026_v26, %v275_v12  ;;  %v396_v36 = vmul.f32 %v1875_v32, %v275_v12  ;;  %v589_v15 = vld [vmem:[%s3385_s7] sm:$0xff]  ;;  %v598_v32 = vld [vmem:[%s3385_s7 + $0x48] sm:$0xff] }
 0x1a2   :  { %v308_v22 = vsel %vm304_vm3, %v301_v19, 0.0  ;;  %v337_v27 = vsel %vm304_vm3, %v331_v23, 0.0  ;;  %v370_v33 = vsel %vm304_vm3, %v364_v28, 0.0  ;;  %v403_v39 = vsel %vm304_vm3, %v397_v34, 0.0  ;;  %v594_v23 = vld [vmem:[%s3385_s7 + $0x28] sm:$0xff]  ;;  %v595_v28 = vld [vmem:[%s3385_s7 + $0x30] sm:$0xff] }
 0x1a3   :  { %v2995_v13 = vpop.f32.mrb[2].mxu0  ;;  %v305_v18 = vsel %vm304_vm3, %v300_v16, 0.0  ;;  %v334_v29 = vsel %vm304_vm3, %v330_v24, 0.0  ;;  %v367_v35 = vsel %vm304_vm3, %v363_v30, 0.0  ;;  %v429_v40 = vmul.f32 %v1879_v37, %v275_v12  ;;  %v599_v34 = vld [vmem:[%s3385_s7 + $0x50] sm:$0xff]  ;;  %v601_v37 = vld [vmem:[%s3385_s7 + $0x60] sm:$0xff] }
 0x1a4   :  { %v2997_v14 = vpop.f32.mrb[3].mxu0  ;;  %v400_v41 = vsel %vm304_vm3, %v396_v36, 0.0  ;;  %v333_v42 = vmul.f32 %v2995_v13, %v1870_v38  ;;  %v430_v46 = vmul.f32 %v2055_v11, %v1880_v43  ;;  %v366_v48 = vmul.f32 %v2995_v13, %v3055_v44  ;;  %v602_v38 = vld [vmem:[%s3385_s7 + $0x68] sm:$0xff]  ;;  %v701_v43 = vld [vmem:[%s3387_s9] sm:$0xff] }
 0x1a5   :  { %463 = vrot.lane.b32.xlu0 %v2055_v11, %s2733_s1  ;;  %465 = vrot.lane.b32.xlu1 %v2997_v14, %s2733_s1  ;;  %v433_v45 = vsel %vm304_vm3, %v429_v40, 0.0  ;;  %v303_v52 = vmul.f32 %v2995_v13, %v299_v49  ;;  %v302_v54 = vmul.f32 %v298_v50, %v2997_v14  ;;  %v332_v58 = vmul.f32 %v1869_v55, %v2997_v14  ;;  %v603_v40 = vld [vmem:[%s3385_s7 + $0x70] sm:$0xff]  ;;  %v705_v50 = vld [vmem:[%s3387_s9 + $0x20] sm:$0xff] }
 0x1a6   :  { %v343_v47 = vsel %vm304_vm3, %v333_v42, 0.0  ;;  %v436_v51 = vsel %vm304_vm3, %v430_v46, 0.0  ;;  %v376_v53 = vsel %vm304_vm3, %v366_v48, 0.0  ;;  %v365_v60 = vmul.f32 %v3077_v56, %v2997_v14  ;;  %v703_v46 = vld [vmem:[%s3387_s9 + $0x10] sm:$0xff]  ;;  %v704_v48 = vld [vmem:[%s3387_s9 + $0x18] sm:$0xff] }
 0x1a7   :  { %v314_v57 = vsel %vm304_vm3, %v303_v52, 0.0  ;;  %v311_v59 = vsel %vm304_vm3, %v302_v54, 0.0  ;;  %v340_v63 = vsel %vm304_vm3, %v332_v58, 0.0  ;;  %v399_v0 = vmul.f32 %v2995_v13, %v1878_v61  ;;  %v708_v54 = vld [vmem:[%s3387_s9 + $0x38] sm:$0xff]  ;;  %v710_v58 = vld [vmem:[%s3387_s9 + $0x48] sm:$0xff] }
 0x1a8   :  { %v373_v2 = vsel %vm304_vm3, %v365_v60, 0.0  ;;  %v398_v3 = vmul.f32 %v1877_v62, %v2997_v14  ;;  %v432_v8 = vmul.f32 %v2995_v13, %v1882_v4  ;;  %v431_v10 = vmul.f32 %v1881_v5, %v2997_v14  ;;  %v591_v14 = vld [vmem:[%s3385_s7 + $0x10] sm:$0xff]  ;;  %v712_v61 = vld [vmem:[%s3387_s9 + $0x58] sm:$0xff] }
 0x1a9   :  { %467 = vrot.lane.b32.xlu1 %v2995_v13, %s2733_s1  ;;  %v409_v7 = vsel %vm304_vm3, %v399_v0, 0.0  ;;  %v590_v13 = vld [vmem:[%s3385_s7 + $0x8] sm:$0xff]  ;;  %v2237_v49 = vpack.c.bf16 %v704_v48, %v703_v46  ;;  %v711_v60 = vld [vmem:[%s3387_s9 + $0x50] sm:$0xff] }
 0x1aa   :  { %v406_v9 = vsel %vm304_vm3, %v398_v3, 0.0  ;;  %v442_v11 = vsel %vm304_vm3, %v432_v8, 0.0  ;;  %v439_v12 = vsel %vm304_vm3, %v431_v10, 0.0  ;;  %v2201_v16 = vpack.c.bf16 %v590_v13, %v589_v15  ;;  %v714_v0 = vld [vmem:[%s3387_s9 + $0x68] sm:$0xff] }
 0x1ab   :  { %v2253_v62 = vpack.c.bf16 %v712_v61, %v711_v60 }
 0x1ac   :  { %2202 = vmatprep.subr.bf16.mxu0 %v2201_v16 }
 0x1c4   :  { %306 = vadd.xlane.f32.xlu0 %v305_v18  ;;  %v592_v18 = vld [vmem:[%s3385_s7 + $0x18] sm:$0xff] }
 0x1c5   :  { %v2205_v19 = vpack.c.bf16 %v592_v18, %v591_v14 }
 0x1c8   :  { %309 = vadd.xlane.f32.xlu0 %v308_v22  ;;  %v593_v22 = vld [vmem:[%s3385_s7 + $0x20] sm:$0xff] }
 0x1c9   :  { %v2209_v24 = vpack.c.bf16 %v594_v23, %v593_v22 }
 0x1cc   :  { %338 = vadd.xlane.f32.xlu0 %v337_v27 }
 0x1cd   :  { %335 = vadd.xlane.f32.xlu1 %v334_v29  ;;  %v596_v29 = vld [vmem:[%s3385_s7 + $0x38] sm:$0xff] }
 0x1ce   :  { %v2213_v30 = vpack.c.bf16 %v596_v29, %v595_v28 }
 0x1d0   :  { %371 = vadd.xlane.f32.xlu0 %v370_v33  ;;  %v2217_v33 = vpack.c.bf16 %v598_v32, %v597_v31 }
 0x1d1   :  { %368 = vadd.xlane.f32.xlu1 %v367_v35  ;;  %v600_v35 = vld [vmem:[%s3385_s7 + $0x58] sm:$0xff] }
 0x1d2   :  { %v2221_v36 = vpack.c.bf16 %v600_v35, %v599_v34 }
 0x1d4   :  { %404 = vadd.xlane.f32.xlu0 %v403_v39  ;;  %v2225_v39 = vpack.c.bf16 %v602_v38, %v601_v37 }
 0x1d5   :  { %401 = vadd.xlane.f32.xlu1 %v400_v41  ;;  %v604_v41 = vld [vmem:[%s3385_s7 + $0x78] sm:$0xff] }
 0x1d6   :  { %v2229_v42 = vpack.c.bf16 %v604_v41, %v603_v40 }
 0x1d8   :  { %434 = vadd.xlane.f32.xlu0 %v433_v45  ;;  %v702_v45 = vld [vmem:[%s3387_s9 + $0x8] sm:$0xff] }
 0x1d9   :  { %344 = vadd.xlane.f32.xlu1 %v343_v47  ;;  %v2233_v47 = vpack.c.bf16 %v702_v45, %v701_v43 }
 0x1db   :  { %2234 = vmatprep.subr.bf16.mxu1 %v2233_v47 }
 0x1dc   :  { %437 = vadd.xlane.f32.xlu0 %v436_v51  ;;  %v706_v51 = vld [vmem:[%s3387_s9 + $0x28] sm:$0xff]  ;;  %2236 = vmatpush3.bf16.msra.mxu1 %v2233_v47 }
 0x1dd   :  { %377 = vadd.xlane.f32.xlu1 %v376_v53  ;;  %2238 = vmatprep.subr.bf16.mxu1 %v2237_v49  ;;  %v2241_v52 = vpack.c.bf16 %v706_v51, %v705_v50  ;;  %v707_v53 = vld [vmem:[%s3387_s9 + $0x30] sm:$0xff] }
 0x1de   :  { %v2245_v55 = vpack.c.bf16 %v708_v54, %v707_v53 }
 0x1e0   :  { %315 = vadd.xlane.f32.xlu0 %v314_v57  ;;  %2240 = vmatpush3.bf16.msra.mxu1 %v2237_v49  ;;  %v709_v57 = vld [vmem:[%s3387_s9 + $0x40] sm:$0xff] }
 0x1e1   :  { %312 = vadd.xlane.f32.xlu1 %v311_v59  ;;  %2242 = vmatprep.subr.bf16.mxu1 %v2241_v52  ;;  %v2249_v59 = vpack.c.bf16 %v710_v58, %v709_v57 }
 0x1e4   :  { %341 = vadd.xlane.f32.xlu0 %v340_v63  ;;  %2244 = vmatpush3.bf16.msra.mxu1 %v2241_v52  ;;  %v713_v63 = vld [vmem:[%s3387_s9 + $0x60] sm:$0xff] }
 0x1e5   :  { %374 = vadd.xlane.f32.xlu1 %v373_v2  ;;  %2246 = vmatprep.subr.bf16.mxu1 %v2245_v55  ;;  %v2257_v2 = vpack.c.bf16 %v714_v0, %v713_v63 }
 0x1e8   :  { %410 = vadd.xlane.f32.xlu0 %v409_v7  ;;  %2248 = vmatpush3.bf16.msra.mxu1 %v2245_v55 }
 0x1e9   :  { %407 = vadd.xlane.f32.xlu1 %v406_v9  ;;  %2250 = vmatprep.subr.bf16.mxu1 %v2249_v59 }
 0x1ec   :  { %443 = vadd.xlane.f32.xlu0 %v442_v11  ;;  %2252 = vmatpush3.bf16.msra.mxu1 %v2249_v59 }
 0x1ed   :  { %440 = vadd.xlane.f32.xlu1 %v439_v12  ;;  %2254 = vmatprep.subr.bf16.mxu1 %v2253_v62 }
 0x1f0   :  { %2256 = vmatpush3.bf16.msra.mxu1 %v2253_v62 }
 0x1f1   :  { %2258 = vmatprep.subr.bf16.mxu1 %v2257_v2 }
 0x1f4   :  { %2260 = vmatpush3.bf16.msra.mxu1 %v2257_v2 }
 0x213   :  { %v462_v17 = vpop.permute.xlu0 %461 }
 0x214   :  { %2061 = vmatprep.mubr.msk.f32.mxu0 %vm476_vm4, %v462_v17  ;;  %v317_v17 = vlaneseq }
 0x216   :  { %v3200_v14 = vshrl.u32 %v317_v17, 7 }
 0x217   :  { %v464_v20 = vpop.permute.xlu0 %463  ;;  %v466_v21 = vpop.permute.xlu1 %465 }
 0x218   :  { %2062 = vmatmul.mubr.msk.f32.vlgmr.msra.gmra.mrb[4].mxu0 %vm476_vm4, %v464_v20  ;;  %v3203_v20 = vsub.s32 1, %v3200_v14  ;;  %v381_v22 = vsub.s32 2, %v3200_v14 }
 0x219   :  { %2064 = vmatprep.mubr.msk.f32.mxu0 %vm476_vm4, %v466_v21  ;;  %2204 = vmatpush3.bf16.msra.mxu0 %v2201_v16  ;;  %v3206_v21 = vsub.s32 0, %v3200_v14 }
 0x21a   :  { %2206 = vmatprep.subr.bf16.mxu0 %v2205_v19  ;;  %v349_v23 = vrot.slane %v2991_v6, %v3203_v20 }
 0x21b   :  { %v468_v27 = vpop.permute.xlu1 %467  ;;  %v320_v29 = vrot.slane %v2991_v6, %v3206_v21 }
 0x21c   :  { %2065 = vmatmul.mubr.msk.f32.gmra.mrb[6].mxu0 %vm476_vm4, %v468_v27 }
 0x21d   :  { %2208 = vmatpush3.bf16.msra.mxu0 %v2205_v19 }
 0x21e   :  { %2210 = vmatprep.subr.bf16.mxu0 %v2209_v24 }
 0x221   :  { %2212 = vmatpush3.bf16.msra.mxu0 %v2209_v24  ;;  %v414_v24 = vsub.s32 3, %v3200_v14 }
 0x222   :  { %2214 = vmatprep.subr.bf16.mxu0 %v2213_v30 }
 0x223   :  { %v415_v32 = vrot.slane %v2991_v6, %v414_v24 }
 0x225   :  { %2216 = vmatpush3.bf16.msra.mxu0 %v2213_v30  ;;  %v382_v30 = vrot.slane %v2991_v6, %v381_v22 }
 0x226   :  { %2218 = vmatprep.subr.bf16.mxu0 %v2217_v33 }
 0x229   :  { %2220 = vmatpush3.bf16.msra.mxu0 %v2217_v33  ;;  %v447_v33 = vsub.s32 4, %v3200_v14 }
 0x22a   :  { %2222 = vmatprep.subr.bf16.mxu0 %v2221_v36 }
 0x22b   :  { %v448_v46 = vrot.slane %v2991_v6, %v447_v33 }
 0x22d   :  { %2224 = vmatpush3.bf16.msra.mxu0 %v2221_v36 }
 0x22e   :  { %2226 = vmatprep.subr.bf16.mxu0 %v2225_v39 }
 0x231   :  { %2228 = vmatpush3.bf16.msra.mxu0 %v2225_v39 }
 0x232   :  { %2230 = vmatprep.subr.bf16.mxu0 %v2229_v42 }
 0x235   :  { %2232 = vmatpush3.bf16.msra.mxu0 %v2229_v42 }
 0x251   :  { %v307_v3 = vpop.xlane.xlu0 %306 }
 0x252   :  { %v321_v35 = vmul.f32 %v320_v29, %v307_v3 }
 0x255   :  { %v310_v4 = vpop.xlane.xlu0 %309 }
 0x256   :  { %v322_v39 = vmul.f32 %v320_v29, %v310_v4 }
 0x259   :  { %v339_v5 = vpop.xlane.xlu0 %338 }
 0x25a   :  { %v336_v7 = vpop.xlane.xlu1 %335  ;;  %v351_v34 = vmul.f32 %v349_v23, %v339_v5 }
 0x25b   :  { %v350_v31 = vmul.f32 %v349_v23, %v336_v7 }
 0x25c   :  { %v355_v48 = vadd.f32 %v351_v34, %v322_v39 }
 0x25d   :  { %v372_v8 = vpop.xlane.xlu0 %371  ;;  %v354_v43 = vadd.f32 %v350_v31, %v321_v35 }
 0x25e   :  { %v369_v9 = vpop.xlane.xlu1 %368  ;;  %v384_v40 = vmul.f32 %v382_v30, %v372_v8 }
 0x25f   :  { %v383_v36 = vmul.f32 %v382_v30, %v369_v9  ;;  %v1887_v9 = vld [vmem:[#allocation8] ss:$0 sm:$0xff] }
 0x260   :  { %v388_v54 = vadd.f32 %v384_v40, %v355_v48  ;;  %v1888_v40 = vld [vmem:[#allocation9] ss:$0 sm:$0xff] }
 0x261   :  { %v405_v10 = vpop.xlane.xlu0 %404  ;;  %v387_v51 = vadd.f32 %v383_v36, %v354_v43 }
 0x262   :  { %v402_v11 = vpop.xlane.xlu1 %401  ;;  %v417_v49 = vmul.f32 %v415_v32, %v405_v10 }
 0x263   :  { %v416_v45 = vmul.f32 %v415_v32, %v402_v11 }
 0x264   :  { %v421_v61 = vadd.f32 %v417_v49, %v388_v54  ;;  %v3231_v54 = vld [vmem:[%s3406_s5] sm:$0x3] }
 0x265   :  { %v435_v12 = vpop.xlane.xlu0 %434  ;;  %v420_v58 = vadd.f32 %v416_v45, %v387_v51  ;;  %vm1061_vm12 = vcmp.lt.s32.totalorder %v3231_v54, 0 }
 0x266   :  { %v345_v15 = vpop.xlane.xlu1 %344  ;;  %v449_v59 = vmul.f32 %v448_v46, %v435_v12 }
 0x267   :  { %v353_v50 = vmul.f32 %v349_v23, %v345_v15 }
 0x268   :  { %v453_v10 = vadd.f32 %v449_v59, %v420_v58 }
 0x269   :  { %v438_v13 = vpop.xlane.xlu0 %437 }
 0x26a   :  { %v378_v16 = vpop.xlane.xlu1 %377  ;;  %v450_v55 = vmul.f32 %v448_v46, %v438_v13 }
 0x26b   :  { %v386_v62 = vmul.f32 %v382_v30, %v378_v16 }
 0x26c   :  { %v454_v5 = vadd.f32 %v450_v55, %v421_v61  ;;  %v1062_v55 = vand.u32 2139095040, %v3231_v54  ;;  %v2734_v61 = vmov 0  }
 0x26d   :  { %v316_v18 = vpop.xlane.xlu0 %315  ;;  %2458 = vset.pattern.permute.xlu0 %v2734_v61  ;;  %2457 = vset.pattern.permute.xlu1 %v2734_v61 }
 0x26e   :  { %v313_v19 = vpop.xlane.xlu1 %312  ;;  %v324_v41 = vmul.f32 %v320_v29, %v316_v18 }
 0x26f   :  { %v323_v47 = vmul.f32 %v320_v29, %v313_v19 }
 0x270   :  { %v357_v57 = vadd.f32 %v353_v50, %v324_v41 }
 0x271   :  { %v342_v27 = vpop.xlane.xlu0 %341 }
 0x272   :  { %v375_v28 = vpop.xlane.xlu1 %374  ;;  %v352_v37 = vmul.f32 %v349_v23, %v342_v27  ;;  %v390_v6 = vadd.f32 %v386_v62, %v357_v57  ;;  %v1063_v57 = vshrl.u32 %v1062_v55, 23 }
 0x273   :  { %v385_v53 = vmul.f32 %v382_v30, %v375_v28 }
 0x274   :  { %v356_v52 = vadd.f32 %v352_v37, %v323_v47  ;;  %v715_v37 = vld [vmem:[%s3387_s9 + $0x70] sm:$0xff]  ;;  %v1893_v58 = vadd.s32 4294967169, %v1063_v57 }
 0x275   :  { %v411_v38 = vpop.xlane.xlu0 %410 }
 0x276   :  { %v408_v42 = vpop.xlane.xlu1 %407  ;;  %v419_v63 = vmul.f32 %v415_v32, %v411_v38  ;;  %v389_v2 = vadd.f32 %v385_v53, %v356_v52  ;;  %v716_v38 = vld [vmem:[%s3387_s9 + $0x78] sm:$0xff]  ;;  %v1069_v59 = vadd.s32 1, %v1893_v58 }
 0x277   :  { %v418_v3 = vmul.f32 %v415_v32, %v408_v42  ;;  %v2261_v39 = vpack.c.bf16 %v716_v38, %v715_v37 }
 0x278   :  { %v423_v11 = vadd.f32 %v419_v63, %v390_v6  ;;  %vm1070_vm5 = vcmp.gt.s32.totalorder %v1069_v59, 0 }
 0x279   :  { %v444_v60 = vpop.xlane.xlu0 %443  ;;  %v422_v17 = vadd.f32 %v418_v3, %v389_v2  ;;  %2262 = vmatprep.subr.bf16.mxu1 %v2261_v39  ;;  %v2736_v3 = vmov 920167782  }
 0x27a   :  { %v441_v0 = vpop.xlane.xlu1 %440  ;;  %v452_v4 = vmul.f32 %v448_v46, %v444_v60  ;;  %2264 = vmatpush3.bf16.msra.mxu1 %v2261_v39  ;;  %v1071_v60 = vsel %vm1070_vm5, %v1069_v59, 0  ;;  %vm1151_vm5 = vweird.f32 %v3231_v54 }
 0x27b   :  { %v451_v7 = vmul.f32 %v448_v46, %v441_v0  ;;  %v1073_v62 = vand.u32 31, %v1071_v60  ;;  %v2735_v0 = vmov 2102212464  }
 0x27c   :  { %v456_v19 = vadd.f32 %v452_v4, %v423_v11  ;;  %v1059_v4 = vand.u32 2147483647, %v3231_v54 }
 0x27d   :  { %v455_v27 = vadd.f32 %v451_v7, %v422_v17  ;;  %v1074_v63 = vsub.s32 32, %v1073_v62  ;;  %v1085_v2 = vshll.u32 %v2735_v0, %v1073_v62  ;;  %v1088_v7 = vshll.u32 %v2736_v3, %v1073_v62 }
 0x27e   :  { %vm1060_vm13 = vcmp.le.f32.partialorder %v1059_v4, 0.7853982 }
 0x27f   :  { %v1086_v6 = vshrl.u32 %v2736_v3, %v1074_v63 }
 0x2eb   :  { %v2063_v8 = vpop.f32.mrb[4].mxu0 }
 0x2ec   :  { %v571_v15 = vadd.f32 %v2063_v8, %v454_v5  ;;  %v551_v13 = vpop.f32.mrb[5].mxu0  ;;  %v1072_v5 = vshrl.u32 %v1071_v60, 5  ;;  %v2737_v8 = vmov 1326507024  }
 0x2ed   :  { %v570_v18 = vadd.f32 %v551_v13, %v453_v10  ;;  %v2738_v10 = vmov 683565275  }
 0x2ee   :  { %v582_v12 = vadd.f32 %v1887_v9, %v571_v15  ;;  %v1076_v11 = vshll.u32 %v2738_v10, %v1073_v62  ;;  %v2739_v15 = vmov 2475754826   ;;  %vm1094_vm6 = vcmp.lt.s32.totalorder %v1072_v5, 4 }
 0x2ef   :  { %v581_v23 = vadd.f32 %v1887_v9, %v570_v18  ;;  %v2066_v16 = vpop.f32.mrb[6].mxu0  ;;  %v1077_v13 = vshrl.u32 %v2739_v15, %v1074_v63  ;;  %v1079_v17 = vshll.u32 %v2739_v15, %v1073_v62  ;;  %v2740_v18 = vmov 2131351028  }
 0x2f0   :  { %v573_v28 = vadd.f32 %v2066_v16, %v456_v19  ;;  %v561_v29 = vpop.f32.mrb[7].mxu0  ;;  %v586_v32 = vmax.f32 %v582_v12, 0.0  ;;  %v1080_v12 = vshrl.u32 %v2740_v18, %v1074_v63  ;;  %v1082_v19 = vshll.u32 %v2740_v18, %v1073_v62 }
 0x2f1   :  { %v585_v30 = vmax.f32 %v581_v23, 0.0  ;;  %v572_v31 = vadd.f32 %v561_v29, %v455_v27  ;;  %v1083_v23 = vshrl.u32 %v2735_v0, %v1074_v63  ;;  %v1087_v16 = vor.u32 %v1086_v6, %v1085_v2 }
 0x2f2   :  { %v584_v33 = vadd.f32 %v1887_v9, %v573_v28  ;;  %v1066_v27 = vand.u32 8388607, %v1059_v4  ;;  %v1078_v29 = vor.u32 %v1077_v13, %v1076_v11  ;;  %vm1091_vm7 = vcmp.lt.s32.totalorder %v1072_v5, 1 }
 0x2f3   :  { %v583_v34 = vadd.f32 %v1887_v9, %v572_v31  ;;  %2099 = vmatprep.mubr.f32.mxu0 %v585_v30  ;;  %v1089_v9 = vshrl.u32 %v2737_v8, %v1074_v63  ;;  %v1081_v30 = vor.u32 %v1080_v12, %v1079_v17  ;;  %v1084_v31 = vor.u32 %v1083_v23, %v1082_v19 }
 0x2f4   :  { %2100 = vmatmul.mubr.f32.vlgmr.msra.gmra.mrb[8].mxu0 %v586_v32  ;;  %v588_v36 = vmax.f32 %v584_v33, 0.0  ;;  %vm1093_vm8 = vcmp.lt.s32.totalorder %v1072_v5, 3  ;;  %v1100_v32 = vsel %vm1094_vm6, %v1087_v16, 920167782  ;;  %v1067_v33 = vor.u32 8388608, %v1066_v27 }
 0x2f5   :  { %v587_v35 = vmax.f32 %v583_v34, 0.0  ;;  %v1090_v28 = vor.u32 %v1089_v9, %v1088_v7  ;;  %vm1092_vm9 = vcmp.lt.s32.totalorder %v1072_v5, 2  ;;  %v1103_v37 = vsel %vm1091_vm7, %v1081_v30, %v1084_v31 }
 0x2f6   :  { %v1107_v39 = vshll.u32 %v1067_v33, 8 }
 0x2f7   :  { %2102 = vmatprep.mubr.f32.mxu0 %v587_v35  ;;  %v1104_v34 = vsel %vm1094_vm6, %v1090_v28, 1326507024  ;;  %v1099_v35 = vsel %vm1091_vm7, %v1078_v29, %v1081_v30 }
 0x2f8   :  { %2103 = vmatmul.mubr.f32.gmra.mrb[10].mxu0 %v588_v36  ;;  %v1101_v36 = vsel %vm1093_vm8, %v1084_v31, %v1100_v32  ;;  %v1105_v38 = vsel %vm1093_vm8, %v1087_v16, %v1104_v34 }
 0x3c7   :  { %v2101_v41 = vpop.f32.mrb[8].mxu0 }
 0x3c8   :  { %v684_v42 = vadd.f32 %v2101_v41, %v1888_v40  ;;  %v678_v43 = vpop.f32.mrb[9].mxu0  ;;  %v1106_v41 = vsel %vm1092_vm9, %v1103_v37, %v1105_v38 }
 0x3c9   :  { %v679_v45 = vadd.f32 %v1888_v40, %v678_v43 }
 0x3ca   :  { %v698_v48 = vmax.f32 %v684_v42, 0.0 }
 0x3cb   :  { %v2104_v46 = vpop.f32.mrb[10].mxu0  ;;  %v697_v47 = vmax.f32 %v679_v45, 0.0  ;;  %v1075_v45 = vshrl.u32 %v2738_v10, %v1074_v63 }
 0x3cc   :  { %v694_v49 = vadd.f32 %v2104_v46, %v1888_v40  ;;  %v688_v50 = vpop.f32.mrb[11].mxu0 }
 0x3cd   :  { %v689_v51 = vadd.f32 %v1888_v40, %v688_v50  ;;  %2137 = vmatprep.mubr.f32.mxu1 %v697_v47  ;;  %v1102_v40 = vsel %vm1092_vm9, %v1099_v35, %v1101_v36  ;;  %v3248_v46 = vmul.u32.u64.low %v1107_v39, %v1106_v41  ;;  %v3249_v47 = vmul.u32.u64.high %v1107_v39, %v1106_v41, %v3248_v46 }
 0x3ce   :  { %2138 = vmatmul.mubr.f32.vlgmr.msra.gmra.mrb[0].mxu1 %v698_v48  ;;  %v700_v53 = vmax.f32 %v694_v49, 0.0  ;;  %v3245_v42 = vmul.u32.u64.low %v1107_v39, %v1102_v40  ;;  %v3246_v43 = vmul.u32.u64.high %v1107_v39, %v1102_v40, %v3245_v42  ;;  %v1096_v48 = vsel %vm1094_vm6, %v1084_v31, 2102212464 }
 0x3cf   :  { %v699_v52 = vmax.f32 %v689_v51, 0.0  ;;  %v1095_v49 = vsel %vm1091_vm7, %v1075_v45, %v1078_v29  ;;  %v1097_v50 = vsel %vm1093_vm8, %v1081_v30, %v1096_v48  ;;  %v1889_v30 = vld [vmem:[#allocation2] ss:$0 sm:$0xff]  ;;  %vm2742_vm7 = vmmov 0  }
 0x3d0   :  { %v1098_v51 = vsel %vm1092_vm9, %v1095_v49, %v1097_v50  ;;  %vm1116_vm10 = vc.u32 %v3249_v47, %v3245_v42  ;;  %v1115_v5 = vadd.s32 %v3245_v42, %v3249_v47  ;;  %vm834_vm8 = vcmask 261120  }
 0x3d1   :  { %2140 = vmatprep.mubr.f32.mxu1 %v699_v52  ;;  %v1117_v52 = vadd.s32 1, %v3246_v43 }
 0x3d2   :  { %2141 = vmatmul.mubr.f32.gmra.mrb[2].mxu1 %v700_v53  ;;  %v1114_v53 = vmul.u32 %v1107_v39, %v1098_v51 }
 0x3d3   :  { %v1118_v55 = vsel %vm1116_vm10, %v1117_v52, %v3246_v43  ;;  %v2741_v43 = vmov 0.0|0.0  }
 0x3d4   :  { %v1119_v57 = vadd.s32 %v1118_v55, %v1114_v53  ;;  %2265 = vmatprep.subr.bf16.mxu0 %v2741_v43  ;;  %v2743_v53 = vmov 0.0  }
 0x3d5   :  { %2151 = vmatprep.mubr.msk.f32.mxu0 %vm2742_vm7, %v2743_v53  ;;  %1447 = vmatprep.mubr.f32.mxu1 %v2743_v53 }
 0x3d6   :  { %v1120_v58 = vadd.s32 536870912, %v1119_v57 }
 0x3d8   :  { %v1121_v59 = vshrl.u32 %v1120_v58, 30  ;;  %v1302_v58 = vld [vmem:[#allocation12 + $0x28] sm:$0xff] }
 0x3da   :  { %v1122_v60 = vshll.u32 %v1121_v59, 30  ;;  %v1145_v16 = vsub.s32 4, %v1121_v59 }
 0x3dc   :  { %v1123_v61 = vsub.s32 %v1119_v57, %v1122_v60  ;;  %v1146_v28 = vsel %vm1061_vm12, %v1145_v16, %v1121_v59  ;;  %v1297_v60 = vld [vmem:[#allocation12] sm:$0xff] }
 0x3dd   :  { %v1148_v29 = vsel %vm1060_vm13, 0, %v1146_v28 }
 0x3de   :  { %v1125_v62 = vsub.s32 0, %v1123_v61  ;;  %v1152_v32 = vadd.s32 3, %v1148_v29  ;;  %v1267_v45 = vand.u32 3, %v1148_v29 }
 0x3e0   :  { %v1894_v63 = vmin.u32 %v1125_v62, %v1123_v61  ;;  %v1153_v4 = vand.u32 3, %v1152_v32  ;;  %vm1269_vm1 = vcmp.eq.s32.totalorder %v1267_v45, 0  ;;  %vm1272_vm2 = vcmp.eq.s32.totalorder %v1267_v45, 2  ;;  %v910_v32 = vld [vmem:[%s3389_s11 + $0x8] sm:$0xff] }
 0x3e1   :  { %vm1268_vm6 = vcmp.lt.s32.totalorder %v1267_v45, 2  ;;  %v1311_v45 = vld [vmem:[#allocation12 + $0x70] sm:$0xff] }
 0x3e2   :  { %v1127_v0 = vclz %v1894_v63  ;;  %vm1155_vm14 = vcmp.eq.s32.totalorder %v1153_v4, 0  ;;  %vm1158_vm15 = vcmp.eq.s32.totalorder %v1153_v4, 2  ;;  %vm1154_vm0 = vcmp.lt.s32.totalorder %v1153_v4, 2  ;;  %v1306_v63 = vld [vmem:[#allocation12 + $0x48] sm:$0xff]  ;;  %v1308_v4 = vld [vmem:[#allocation12 + $0x58] sm:$0xff] }
 0x3e4   :  { %v1895_v2 = vadd.s32 4294967294, %v1127_v0  ;;  %v1310_v0 = vld [vmem:[#allocation12 + $0x68] sm:$0xff] }
 0x3e6   :  { %vm1896_vm11 = vcmp.lt.s32.totalorder %v1895_v2, 0 }
 0x3e7   :  { %v1130_v3 = vsel %vm1896_vm11, 0, %v1895_v2  ;;  %v2278_v2 = vpack.c.bf16 %v1310_v0, %v1306_v63  ;;  %v1330_v63 = vld [vmem:[#allocation12 + $0x108] sm:$0xff] }
 0x3e8   :  { %v1135_v6 = vsub.s32 4294967266, %v1130_v3  ;;  %v1131_v7 = vsub.s32 32, %v1130_v3  ;;  %v1132_v9 = vshll.u32 %v1123_v61, %v1130_v3  ;;  %v1301_v61 = vld [vmem:[#allocation12 + $0x20] sm:$0xff]  ;;  %v1334_v0 = vld [vmem:[#allocation12 + $0x128] sm:$0xff] }
 0x3e9   :  { %v2276_v62 = vpack.c.bf16 %v1301_v61, %v1297_v60  ;;  %v1305_v3 = vld [vmem:[#allocation12 + $0x40] sm:$0xff]  ;;  %v1323_v60 = vld [vmem:[#allocation12 + $0xd0] sm:$0xff] }
 0x3ea   :  { %v1136_v8 = vadd.s32 127, %v1135_v6  ;;  %v1133_v10 = vshrl.u32 %v1115_v5, %v1131_v7  ;;  %v1309_v6 = vld [vmem:[#allocation12 + $0x60] sm:$0xff]  ;;  %v1314_v7 = vld [vmem:[#allocation12 + $0x88] sm:$0xff] }
 0x3eb   :  { %v2280_v5 = vpack.c.bf16 %v1309_v6, %v1305_v3  ;;  %v2290_v3 = vpack.c.bf16 %v1334_v0, %v1330_v63  ;;  %v1332_v6 = vld [vmem:[#allocation12 + $0x118] sm:$0xff] }
 0x3ec   :  { %v1137_v11 = vshll.u32 %v1136_v8, 23  ;;  %v1134_v15 = vor.u32 %v1133_v10, %v1132_v9  ;;  %v1318_v8 = vld [vmem:[#allocation12 + $0xa8] sm:$0xff]  ;;  %v1313_v10 = vld [vmem:[#allocation12 + $0x80] sm:$0xff] }
 0x3ed   :  { %v2282_v9 = vpack.c.bf16 %v1318_v8, %v1314_v7  ;;  %v1329_v8 = vld [vmem:[#allocation12 + $0x100] sm:$0xff] }
 0x3ee   :  { %v1138_v13 = vor.u32 4788187, %v1137_v11  ;;  %v1141_v18 = vcvt.s32.f32 %v1134_v15  ;;  %v1317_v11 = vld [vmem:[#allocation12 + $0xa0] sm:$0xff] }
 0x3ef   :  { %v2284_v15 = vpack.c.bf16 %v1317_v11, %v1313_v10  ;;  %v1331_v10 = vld [vmem:[#allocation12 + $0x110] sm:$0xff]  ;;  %v912_v63 = vld [vmem:[%s3389_s11 + $0x18] sm:$0x3] }
 0x3f0   :  { %v1139_v17 = vand.u32 2147483647, %v1138_v13  ;;  %v1322_v13 = vld [vmem:[#allocation12 + $0xc8] sm:$0xff] }
 0x3f2   :  { %v1142_v12 = vmul.f32 %v1141_v18, %v1139_v17  ;;  %v1326_v17 = vld [vmem:[#allocation12 + $0xe8] sm:$0xff] }
 0x3f3   :  { %v2286_v18 = vpack.c.bf16 %v1326_v17, %v1322_v13  ;;  %v1338_v13 = vld [vmem:[#allocation12 + $0x148] sm:$0xff] }
 0x3f4   :  { %v1143_v19 = vxor.u32 2147483648, %v1142_v12  ;;  %v1342_v17 = vld [vmem:[#allocation12 + $0x168] sm:$0xff] }
 0x3f6   :  { %v1144_v23 = vsel %vm1061_vm12, %v1143_v19, %v1142_v12 }
 0x3f7   :  { %v1147_v27 = vsel %vm1060_vm13, %v3231_v54, %v1144_v23  ;;  %v1298_v54 = vld [vmem:[#allocation12 + $0x8] sm:$0xff] }
 0x3f8   :  { %2459 = vcosq.f32 %v1147_v27  ;;  %v2274_v59 = vpack.c.bf16 %v1302_v58, %v1298_v54  ;;  %v1321_v58 = vld [vmem:[#allocation12 + $0xc0] sm:$0xff] }
 0x3f9   :  { %2461 = vsinq.f32 %v1147_v27 }
 0x3fa   :  { %2275 = vmatprep.subr.bf16.mxu1 %v2274_v59  ;;  %v1325_v59 = vld [vmem:[#allocation12 + $0xe0] sm:$0xff] }
 0x3fb   :  { %2277 = vmatpush1.bf16.msra.mxu1 %v2276_v62  ;;  %v2288_v61 = vpack.c.bf16 %v1325_v59, %v1321_v58  ;;  %v1327_v62 = vld [vmem:[#allocation12 + $0xf0] sm:$0xff] }
 0x3fc   :  { %2279 = vmatprep.subr.bf16.mxu1 %v2278_v2  ;;  %v2320_v2 = vpack.c.bf16 %v1327_v62, %v1323_v60  ;;  %v1578_v59 = vld [vmem:[#allocation15 + $0x188] sm:$0xff] }
 0x3ff   :  { %2281 = vmatpush1.bf16.msra.mxu1 %v2280_v5  ;;  %v1336_v5 = vld [vmem:[#allocation12 + $0x138] sm:$0xff] }
 0x400   :  { %2283 = vmatprep.subr.bf16.mxu1 %v2282_v9  ;;  %v2322_v7 = vpack.c.bf16 %v1336_v5, %v1332_v6  ;;  %v1333_v9 = vld [vmem:[#allocation12 + $0x120] sm:$0xff]  ;;  %v1285_v5 = vrot.slane %v912_v63, %v3203_v20 }
 0x401   :  { %v2292_v11 = vpack.c.bf16 %v1333_v9, %v1329_v8 }
 0x402   :  { %v2460_v36 = vpop.eup %2459 }
 0x403   :  { %v2462_v37 = vpop.eup %2461  ;;  %v1159_v42 = vxor.u32 2147483648, %v2460_v36  ;;  %2285 = vmatpush1.bf16.msra.mxu1 %v2284_v15  ;;  %v1335_v15 = vld [vmem:[#allocation12 + $0x130] sm:$0xff] }
 0x404   :  { %v1156_v41 = vxor.u32 2147483648, %v2462_v37  ;;  %2287 = vmatprep.subr.bf16.mxu1 %v2286_v18  ;;  %v2324_v18 = vpack.c.bf16 %v1335_v15, %v1331_v10 }
 0x405   :  { %v1160_v48 = vsel %vm1158_vm15, %v1159_v42, %v2462_v37  ;;  %v1274_v51 = vsel %vm1272_vm2, %v1159_v42, %v2462_v37  ;;  %v1299_v37 = vld [vmem:[#allocation12 + $0x10] sm:$0xff] }
 0x406   :  { %v1157_v47 = vsel %vm1155_vm14, %v2460_v36, %v1156_v41  ;;  %v1271_v50 = vsel %vm1269_vm1, %v2460_v36, %v1156_v41  ;;  %v1307_v42 = vld [vmem:[#allocation12 + $0x50] sm:$0xff] }
 0x407   :  { %v1161_v49 = vsel %vm1154_vm0, %v1157_v47, %v1160_v48  ;;  %v1275_v55 = vsel %vm1268_vm6, %v1271_v50, %v1274_v51  ;;  %v1316_v47 = vld [vmem:[#allocation12 + $0x98] sm:$0xff]  ;;  %v1315_v50 = vld [vmem:[#allocation12 + $0x90] sm:$0xff]  ;;  %2289 = vmatpush1.bf16.msra.mxu1 %v2288_v61 }
 0x408   :  { %v1162_v52 = vsel %vm1151_vm5, nan, %v1161_v49  ;;  %v1276_v57 = vsel %vm1151_vm5, nan, %v1275_v55  ;;  %v1320_v48 = vld [vmem:[#allocation12 + $0xb8] sm:$0xff]  ;;  %v2312_v49 = vpack.c.bf16 %v1311_v45, %v1307_v42  ;;  %v1319_v51 = vld [vmem:[#allocation12 + $0xb0] sm:$0xff]  ;;  %2291 = vmatprep.subr.bf16.mxu1 %v2290_v3  ;;  %v1171_v3 = vrot.slane %v912_v63, %v3206_v21  ;;  %v1553_v63 = vld [vmem:[#allocation15 + $0xc0] sm:$0xff] }
 0x409   :  { %v1328_v55 = vld [vmem:[#allocation12 + $0xf8] sm:$0xff] }
 0x40a   :  { %v1356_v42 = vld [vmem:[#allocation12 + $0x1d8] sm:$0xff] }
 0x40b   :  { %2293 = vmatpush1.bf16.msra.mxu1 %v2292_v11 }
 0x4a1   :  { %v2139_v31 = vpop.f32.mrb[0].mxu1 }
 0x4a2   :  { %v796_v33 = vadd.f32 %v2139_v31, %v1889_v30  ;;  %v790_v34 = vpop.f32.mrb[1].mxu1 }
 0x4a3   :  { %v791_v35 = vadd.f32 %v1889_v30, %v790_v34 }
 0x4a4   :  { %817 = vperm.xlu0 %2458, %v796_v33  }
 0x4a5   :  { %812 = vperm.xlu1 %2457, %v791_v35   ;;  %v2142_v38 = vpop.f32.mrb[2].mxu1  ;;  %v909_v35 = vld [vmem:[%s3389_s11] sm:$0xff] }
 0x4a6   :  { %v800_v39 = vpop.f32.mrb[3].mxu1  ;;  %v806_v46 = vadd.f32 %v2142_v38, %v1889_v30  ;;  %v1303_v38 = vld [vmem:[#allocation12 + $0x30] sm:$0xff] }
 0x4a7   :  { %v801_v40 = vadd.f32 %v1889_v30, %v800_v39  ;;  %v1312_v39 = vld [vmem:[#allocation12 + $0x78] sm:$0xff] }
 0x4a8   :  { %v2310_v41 = vpack.c.bf16 %v1312_v39, %v1308_v4 }
 0x4a9   :  { %822 = vperm.xlu1 %2457, %v801_v40   ;;  %v2308_v40 = vpack.c.bf16 %v1303_v38, %v1299_v37  ;;  %v1347_v37 = vld [vmem:[#allocation12 + $0x190] sm:$0xff] }
 0x4aa   :  { %v1351_v38 = vld [vmem:[#allocation12 + $0x1b0] sm:$0xff] }
 0x4ab   :  { %v2332_v39 = vpack.c.bf16 %v1351_v38, %v1347_v37  ;;  %v1549_v37 = vld [vmem:[#allocation15 + $0xa0] sm:$0xff]  ;;  %v1550_v38 = vld [vmem:[#allocation15 + $0xa8] sm:$0xff] }
 0x4ad   :  { %827 = vperm.xlu1 %2457, %v806_v46  }
 0x4b1   :  { %985 = vrot.lane.b32.xlu1 %v2975_v1, %s2733_s1 }
 0x4b5   :  { %1165 = vperm.xlu1 %2457, %v1162_v52   ;;  %v1324_v52 = vld [vmem:[#allocation12 + $0xd8] sm:$0xff] }
 0x4b6   :  { %v2318_v54 = vpack.c.bf16 %v1328_v55, %v1324_v52  ;;  %v1545_v55 = vld [vmem:[#allocation15 + $0x80] sm:$0xff] }
 0x4b9   :  { %1279 = vperm.xlu1 %2457, %v1276_v57   ;;  %v2316_v57 = vpack.c.bf16 %v1319_v51, %v1315_v50  ;;  %v1355_v50 = vld [vmem:[#allocation12 + $0x1d0] sm:$0xff] }
 0x4ba   :  { %v1359_v51 = vld [vmem:[#allocation12 + $0x1f0] sm:$0xff] }
 0x4bb   :  { %v2336_v52 = vpack.c.bf16 %v1359_v51, %v1355_v50  ;;  %v1552_v50 = vld [vmem:[#allocation15 + $0xb8] sm:$0xff]  ;;  %v1583_v51 = vld [vmem:[#allocation15 + $0x1b0] sm:$0xff] }
 0x523   :  { %v818_v12 = vpop.permute.xlu0 %817 }
 0x524   :  { %v831_v19 = vmul.f32 %v3021_v25, %v818_v12  ;;  %v813_v23 = vpop.permute.xlu1 %812  ;;  %v911_v25 = vld [vmem:[%s3389_s11 + $0x10] sm:$0xff]  ;;  %v2294_v12 = vpack.c.bf16 %v1342_v17, %v1338_v13 }
 0x525   :  { %v830_v16 = vmul.f32 %v3026_v26, %v813_v23  ;;  %v809_v26 = vld [vmem:[%s3407_s12] sm:$0x3]  ;;  %v2272_v34 = vpack.c.bf16 %v911_v25, %v910_v32  ;;  %v1344_v23 = vld [vmem:[#allocation12 + $0x178] sm:$0xff] }
 0x526   :  { %2295 = vmatprep.subr.bf16.mxu1 %v2294_v12  ;;  %v1346_v25 = vld [vmem:[#allocation12 + $0x188] sm:$0xff]  ;;  %v1901_v17 = vld [vmem:[#allocation11] ss:$0 sm:$0xff] }
 0x527   :  { %v2266_v27 = vpack.c.bf16 %v831_v19, %v830_v16  ;;  %v1340_v19 = vld [vmem:[#allocation12 + $0x158] sm:$0xff]  ;;  %v1530_v12 = vld [vmem:[#allocation15 + $0x8] sm:$0xff] }
 0x528   :  { %v823_v28 = vpop.permute.xlu1 %822  ;;  %v2326_v16 = vpack.c.bf16 %v1344_v23, %v1340_v19  ;;  %v1561_v23 = vld [vmem:[#allocation15 + $0x100] sm:$0xff] }
 0x529   :  { %2267 = vmatpush3.bf16.msra.mxu0 %v2266_v27  ;;  %v832_v30 = vmul.f32 %v3077_v56, %v823_v28  ;;  %v1300_v56 = vld [vmem:[#allocation12 + $0x18] sm:$0xff]  ;;  %v1337_v27 = vld [vmem:[#allocation12 + $0x140] sm:$0xff] }
 0x52a   :  { %2268 = vmatprep.subr.bf16.mxu0 %v2741_v43  ;;  %v1341_v28 = vld [vmem:[#allocation12 + $0x160] sm:$0xff] }
 0x52c   :  { %v828_v29 = vpop.permute.xlu1 %827 }
 0x52d   :  { %v833_v31 = vmul.f32 %v3055_v44, %v828_v29  ;;  %v1304_v44 = vld [vmem:[#allocation12 + $0x38] sm:$0xff]  ;;  %v1339_v29 = vld [vmem:[#allocation12 + $0x150] sm:$0xff] }
 0x52e   :  { %v2306_v36 = vpack.c.bf16 %v1304_v44, %v1300_v56  ;;  %v1352_v56 = vld [vmem:[#allocation12 + $0x1b8] sm:$0xff]  ;;  %v1345_v44 = vld [vmem:[#allocation12 + $0x180] sm:$0xff] }
 0x52f   :  { %v2269_v33 = vpack.c.bf16 %v833_v31, %v832_v30  ;;  %v2296_v30 = vpack.c.bf16 %v1341_v28, %v1337_v27  ;;  %v1343_v31 = vld [vmem:[#allocation12 + $0x170] sm:$0xff]  ;;  %v1548_v28 = vld [vmem:[#allocation15 + $0x98] sm:$0xff] }
 0x530   :  { %v986_v46 = vpop.permute.xlu1 %985  ;;  %v2328_v32 = vpack.c.bf16 %v1343_v31, %v1339_v29  ;;  %v1547_v27 = vld [vmem:[#allocation15 + $0x90] sm:$0xff] }
 0x531   :  { %2270 = vmatpush3.bf16.msra.mxu0 %v2269_v33  ;;  %2297 = vmatpush1.bf16.msra.mxu1 %v2296_v30  ;;  %v1350_v33 = vld [vmem:[#allocation12 + $0x1a8] sm:$0xff]  ;;  %v1579_v29 = vld [vmem:[#allocation15 + $0x190] sm:$0xff]  ;;  %v1580_v30 = vld [vmem:[#allocation15 + $0x198] sm:$0xff] }
 0x532   :  { %2271 = vmatprep.subr.bf16.mxu0 %v2741_v43 }
 0x534   :  { %2152 = vmatmul.mubr.msk.f32.vlgmr.msra.gmra.mrb[12].mxu0 %vm834_vm8, %v809_v26  ;;  %v1348_v26 = vld [vmem:[#allocation12 + $0x198] sm:$0xff]  ;;  %v1166_v0 = vpop.permute.xlu1 %1165 }
 0x535   :  { %2273 = vmatpush3.bf16.msra.mxu0 %v2272_v34  ;;  %2158 = vmatprep.mubr.msk.f32.mxu0 %vm2742_vm7, %v2743_v53  ;;  %v2298_v34 = vpack.c.bf16 %v1350_v33, %v1346_v25  ;;  %v1172_v9 = vmul.f32 %v1171_v3, %v1166_v0  ;;  %v1531_v33 = vld [vmem:[#allocation15 + $0x10] sm:$0xff]  ;;  %v1554_v0 = vld [vmem:[#allocation15 + $0xc8] sm:$0xff] }
 0x536   :  { %2161 = vmatprep.subr.mxu0 %v2743_v53  ;;  %v1586_v3 = vld [vmem:[#allocation15 + $0x1c8] sm:$0xff] }
 0x537   :  { %2299 = vmatprep.subr.bf16.mxu1 %v2298_v34 }
 0x538   :  { %2159 = vmatmul.mubr.msk.f32.vlgmr.msra.gmra.mrb[14].mxu0 %vm304_vm3, %v2975_v1  ;;  %v2314_v1 = vpack.c.bf16 %v1320_v48, %v1316_v47  ;;  %v1353_v47 = vld [vmem:[#allocation12 + $0x1c0] sm:$0xff]  ;;  %vm1834_vm3 = vcmask 123904  }
 0x539   :  { %2162 = vmatpush3.msra.mxu0 %v909_v35  ;;  %2163 = vmatprep.mubr.msk.f32.mxu0 %vm2742_vm7, %v2743_v53  ;;  %v2330_v35 = vpack.c.bf16 %v1352_v56, %v1348_v26  ;;  %v1357_v48 = vld [vmem:[#allocation12 + $0x1e0] sm:$0xff]  ;;  %v2342_v56 = vpack.c.bf16 %v1548_v28, %v1547_v27 }
 0x53a   :  { %2307 = vmatprep.subr.bf16.mxu0 %v2306_v36  ;;  %v1349_v36 = vld [vmem:[#allocation12 + $0x1a0] sm:$0xff] }
 0x53b   :  { %v2300_v4 = vpack.c.bf16 %v1349_v36, %v1345_v44  ;;  %v1532_v26 = vld [vmem:[#allocation15 + $0x18] sm:$0xff]  ;;  %v2374_v44 = vpack.c.bf16 %v1580_v30, %v1579_v29  ;;  %v1571_v30 = vld [vmem:[#allocation15 + $0x150] sm:$0xff] }
 0x53c   :  { %2164 = vmatmul.mubr.msk.f32.vlgmr.msra.gmra.mrb[16].mxu0 %vm476_vm4, %v986_v46  ;;  %v1360_v46 = vld [vmem:[#allocation12 + $0x1f8] sm:$0xff]  ;;  %vm1840_vm4 = vcmask 189568  }
 0x53d   :  { %2309 = vmatpush1.bf16.msra.mxu0 %v2308_v40  ;;  %1518 = vmatprep.mubr.f32.mxu0 %v2743_v53  ;;  %v1354_v40 = vld [vmem:[#allocation12 + $0x1c8] sm:$0xff]  ;;  %v1564_v36 = vld [vmem:[#allocation15 + $0x118] sm:$0xff] }
 0x53e   :  { %2311 = vmatprep.subr.bf16.mxu0 %v2310_v41  ;;  %v1358_v41 = vld [vmem:[#allocation12 + $0x1e8] sm:$0xff]  ;;  %2301 = vmatpush1.bf16.msra.mxu1 %v2300_v4  ;;  %v1540_v27 = vld [vmem:[#allocation15 + $0x58] sm:$0xff] }
 0x53f   :  { %v2302_v45 = vpack.c.bf16 %v1358_v41, %v1354_v40  ;;  %v1581_v4 = vld [vmem:[#allocation15 + $0x1a0] sm:$0xff]  ;;  %v2344_v40 = vpack.c.bf16 %v1532_v26, %v1531_v33  ;;  %v1590_v26 = vld [vmem:[#allocation15 + $0x1e8] sm:$0xff] }
 0x540   :  { %v1589_v33 = vld [vmem:[#allocation15 + $0x1e0] sm:$0xff] }
 0x541   :  { %2313 = vmatpush1.bf16.msra.mxu0 %v2312_v49  ;;  %v2334_v49 = vpack.c.bf16 %v1360_v46, %v1356_v42  ;;  %2303 = vmatprep.subr.bf16.mxu1 %v2302_v45  ;;  %v1533_v42 = vld [vmem:[#allocation15 + $0x20] sm:$0xff]  ;;  %v1534_v45 = vld [vmem:[#allocation15 + $0x28] sm:$0xff]  ;;  %v2346_v46 = vpack.c.bf16 %v1550_v38, %v1549_v37 }
 0x542   :  { %2315 = vmatprep.subr.bf16.mxu0 %v2314_v1  ;;  %v2304_v1 = vpack.c.bf16 %v1357_v48, %v1353_v47  ;;  %v1565_v48 = vld [vmem:[#allocation15 + $0x120] sm:$0xff]  ;;  %v1542_v37 = vld [vmem:[#allocation15 + $0x68] sm:$0xff] }
 0x543   :  { %v1573_v38 = vld [vmem:[#allocation15 + $0x160] sm:$0xff] }
 0x544   :  { %2305 = vmatpush1.bf16.msra.mxu1 %v2304_v1  ;;  %v1551_v1 = vld [vmem:[#allocation15 + $0xb0] sm:$0xff] }
 0x545   :  { %2317 = vmatpush1.bf16.msra.mxu0 %v2316_v57  ;;  %v1546_v57 = vld [vmem:[#allocation15 + $0x88] sm:$0xff] }
 0x546   :  { %2319 = vmatprep.subr.bf16.mxu0 %v2318_v54  ;;  %v1577_v54 = vld [vmem:[#allocation15 + $0x180] sm:$0xff]  ;;  %v2338_v58 = vpack.c.bf16 %v1546_v57, %v1545_v55  ;;  %v2348_v55 = vpack.c.bf16 %v1534_v45, %v1533_v42  ;;  %v1560_v42 = vld [vmem:[#allocation15 + $0xf8] sm:$0xff]  ;;  %v1591_v45 = vld [vmem:[#allocation15 + $0x1f0] sm:$0xff] }
 0x547   :  { %v2370_v60 = vpack.c.bf16 %v1578_v59, %v1577_v54  ;;  %v1535_v54 = vld [vmem:[#allocation15 + $0x30] sm:$0xff]  ;;  %v2350_v59 = vpack.c.bf16 %v1552_v50, %v1551_v1 }
 0x548   :  { %2339 = vmatprep.subr.bf16.mxu1 %v2338_v58  ;;  %v1536_v58 = vld [vmem:[#allocation15 + $0x38] sm:$0xff] }
 0x549   :  { %2321 = vmatpush1.bf16.msra.mxu0 %v2320_v2 }
 0x54a   :  { %2323 = vmatprep.subr.bf16.mxu0 %v2322_v7  ;;  %v1280_v7 = vpop.permute.xlu1 %1279 }
 0x54b   :  { %v1286_v15 = vmul.f32 %v1285_v5, %v1280_v7  ;;  %v1537_v7 = vld [vmem:[#allocation15 + $0x40] sm:$0xff] }
 0x54d   :  { %2325 = vmatpush1.bf16.msra.mxu0 %v2324_v18  ;;  %v1529_v18 = vld [vmem:[#allocation15] sm:$0xff] }
 0x54e   :  { %2327 = vmatprep.subr.bf16.mxu0 %v2326_v16  ;;  %v1562_v16 = vld [vmem:[#allocation15 + $0x108] sm:$0xff] }
 0x54f   :  { %v2372_v25 = vpack.c.bf16 %v1562_v16, %v1561_v23  ;;  %v1539_v16 = vld [vmem:[#allocation15 + $0x50] sm:$0xff] }
 0x551   :  { %2329 = vmatpush1.bf16.msra.mxu0 %v2328_v32  ;;  %v2340_v32 = vpack.c.bf16 %v1530_v12, %v1529_v18  ;;  %v1587_v18 = vld [vmem:[#allocation15 + $0x1d0] sm:$0xff]  ;;  %v1588_v12 = vld [vmem:[#allocation15 + $0x1d8] sm:$0xff] }
 0x552   :  { %2331 = vmatprep.subr.bf16.mxu0 %v2330_v35  ;;  %v1563_v35 = vld [vmem:[#allocation15 + $0x110] sm:$0xff]  ;;  %v2390_v29 = vpack.c.bf16 %v1588_v12, %v1587_v18 }
 0x553   :  { %v2376_v41 = vpack.c.bf16 %v1564_v36, %v1563_v35  ;;  %v2394_v35 = vpack.c.bf16 %v1590_v26, %v1589_v33  ;;  %v1541_v36 = vld [vmem:[#allocation15 + $0x60] sm:$0xff]  ;;  %v1747_v18 = vld [vmem:[%s3395_s17 + $0x30] sm:$0xff] }
 0x554   :  { %v1756_v33 = vld [vmem:[%s3395_s17 + $0x78] sm:$0xff] }
 0x555   :  { %2333 = vmatpush1.bf16.msra.mxu0 %v2332_v39  ;;  %v1582_v39 = vld [vmem:[#allocation15 + $0x1a8] sm:$0xff] }
 0x556   :  { %2335 = vmatprep.subr.bf16.mxu0 %v2334_v49  ;;  %v2378_v47 = vpack.c.bf16 %v1582_v39, %v1581_v4  ;;  %v1566_v49 = vld [vmem:[#allocation15 + $0x128] sm:$0xff]  ;;  %v2364_v4 = vpack.c.bf16 %v1542_v37, %v1541_v36 }
 0x557   :  { %v2380_v57 = vpack.c.bf16 %v1566_v49, %v1565_v48  ;;  %v1574_v39 = vld [vmem:[#allocation15 + $0x168] sm:$0xff]  ;;  %v1543_v48 = vld [vmem:[#allocation15 + $0x70] sm:$0xff]  ;;  %v1544_v49 = vld [vmem:[#allocation15 + $0x78] sm:$0xff] }
 0x558   :  { %v2368_v50 = vpack.c.bf16 %v1544_v49, %v1543_v48 }
 0x559   :  { %2337 = vmatpush1.bf16.msra.mxu0 %v2336_v52  ;;  %v1584_v52 = vld [vmem:[#allocation15 + $0x1b8] sm:$0xff] }
 0x55a   :  { %2371 = vmatprep.subr.bf16.mxu0 %v2370_v60  ;;  %v2382_v60 = vpack.c.bf16 %v1584_v52, %v1583_v51  ;;  %v1575_v51 = vld [vmem:[#allocation15 + $0x170] sm:$0xff]  ;;  %v1576_v52 = vld [vmem:[#allocation15 + $0x178] sm:$0xff] }
 0x607   :  { %v904_v61 = vpop.f32.mrb[12].mxu0 }
 0x608   :  { %1835 = vst.msk [vmem:[#allocation20] sm:$0x3] %vm1834_vm3, %v904_v61  ;;  %v2153_v62 = vpop.f32.mrb[13].mxu0  ;;  %v1567_v61 = vld [vmem:[#allocation15 + $0x130] sm:$0xff] }
 0x609   :  { %v1568_v62 = vld [vmem:[#allocation15 + $0x138] sm:$0xff] }
 0x60a   :  { %v2384_v5 = vpack.c.bf16 %v1568_v62, %v1567_v61 }
 0x60b   :  { %v981_v2 = vpop.f32.mrb[14].mxu0 }
 0x60c   :  { %v2160_v6 = vpop.f32.mrb[15].mxu0 }
 0x60d   :  { %v2352_v6 = vpack.c.bf16 %v1536_v58, %v1535_v54 }
 0x60f   :  { %v1055_v8 = vpop.f32.mrb[16].mxu0 }
 0x610   :  { %v1056_v10 = vadd.f32 %v1055_v8, %v981_v2  ;;  %v2165_v11 = vpop.f32.mrb[17].mxu0  ;;  %v1585_v2 = vld [vmem:[#allocation15 + $0x1c0] sm:$0xff]  ;;  %v1538_v8 = vld [vmem:[#allocation15 + $0x48] sm:$0xff] }
 0x611   :  { %v1569_v11 = vld [vmem:[#allocation15 + $0x140] sm:$0xff] }
 0x612   :  { %v1173_v13 = vadd.f32 %v1172_v9, %v1056_v10  ;;  %v2354_v9 = vpack.c.bf16 %v1554_v0, %v1553_v63  ;;  %v2386_v10 = vpack.c.bf16 %v1586_v3, %v1585_v2 }
 0x614   :  { %v1287_v19 = vadd.f32 %v1286_v15, %v1173_v13  ;;  %v1570_v15 = vld [vmem:[#allocation15 + $0x148] sm:$0xff]  ;;  %v1555_v13 = vld [vmem:[#allocation15 + $0xd0] sm:$0xff] }
 0x615   :  { %v2388_v23 = vpack.c.bf16 %v1570_v15, %v1569_v11  ;;  %v1745_v15 = vld [vmem:[%s3395_s17 + $0x20] sm:$0xff] }
 0x616   :  { %v1295_v31 = vadd.f32 %v1901_v17, %v1287_v19  ;;  %v1556_v17 = vld [vmem:[#allocation15 + $0xd8] sm:$0xff]  ;;  %v2356_v19 = vpack.c.bf16 %v1538_v8, %v1537_v7 }
 0x617   :  { %v2358_v28 = vpack.c.bf16 %v1556_v17, %v1555_v13  ;;  %v1746_v13 = vld [vmem:[%s3395_s17 + $0x28] sm:$0xff] }
 0x618   :  { %v1296_v34 = vmax.f32 %v1295_v31, 0.0  ;;  %v1572_v31 = vld [vmem:[#allocation15 + $0x158] sm:$0xff]  ;;  %v2409_v17 = vpack.c.bf16 %v1746_v13, %v1745_v15 }
 0x61a   :  { %1448 = vmatmul.mubr.f32.vlgmr.msra.gmra.mrb[4].mxu1 %v1296_v34  ;;  %1519 = vmatmul.mubr.f32.vlgmr.msra.gmra.mrb[18].mxu0 %v1296_v34  ;;  %v2360_v34 = vpack.c.bf16 %v1540_v27, %v1539_v16  ;;  %v1751_v27 = vld [vmem:[%s3395_s17 + $0x50] sm:$0xff] }
 0x61b   :  { %2341 = vmatpush3.bf16.msra.mxu1 %v2340_v32  ;;  %2373 = vmatpush3.bf16.msra.mxu0 %v2372_v25  ;;  %v1557_v32 = vld [vmem:[#allocation15 + $0xe0] sm:$0xff]  ;;  %v1558_v25 = vld [vmem:[#allocation15 + $0xe8] sm:$0xff] }
 0x61c   :  { %2343 = vmatprep.subr.bf16.mxu1 %v2342_v56  ;;  %2375 = vmatprep.subr.bf16.mxu0 %v2374_v44  ;;  %v2392_v56 = vpack.c.bf16 %v1572_v31, %v1571_v30  ;;  %v2362_v44 = vpack.c.bf16 %v1558_v25, %v1557_v32  ;;  %v1753_v30 = vld [vmem:[%s3395_s17 + $0x60] sm:$0xff]  ;;  %v1754_v31 = vld [vmem:[%s3395_s17 + $0x68] sm:$0xff]  ;;  %v1755_v25 = vld [vmem:[%s3395_s17 + $0x70] sm:$0xff] }
 0x61d   :  { %v2421_v32 = vpack.c.bf16 %v1754_v31, %v1753_v30  ;;  %v2424_v26 = vpack.c.bf16 %v1756_v33, %v1755_v25 }
 0x61f   :  { %2345 = vmatpush3.bf16.msra.mxu1 %v2344_v40  ;;  %2377 = vmatpush3.bf16.msra.mxu0 %v2376_v41  ;;  %v2396_v40 = vpack.c.bf16 %v1574_v39, %v1573_v38  ;;  %v1559_v41 = vld [vmem:[#allocation15 + $0xf0] sm:$0xff] }
 0x620   :  { %2347 = vmatprep.subr.bf16.mxu1 %v2346_v46  ;;  %2379 = vmatprep.subr.bf16.mxu0 %v2378_v47  ;;  %v2366_v46 = vpack.c.bf16 %v1560_v42, %v1559_v41  ;;  %v1592_v47 = vld [vmem:[#allocation15 + $0x1f8] sm:$0xff] }
 0x621   :  { %v2398_v1 = vpack.c.bf16 %v1592_v47, %v1591_v45 }
 0x623   :  { %2349 = vmatpush3.bf16.msra.mxu1 %v2348_v55  ;;  %2381 = vmatpush3.bf16.msra.mxu0 %v2380_v57  ;;  %v2400_v55 = vpack.c.bf16 %v1576_v52, %v1575_v51  ;;  %v1361_v57 = vld [vmem:[#allocation14] sm:$0xf] }
 0x624   :  { %2351 = vmatprep.subr.bf16.mxu1 %v2350_v59  ;;  %2383 = vmatprep.subr.bf16.mxu0 %v2382_v60  ;;  %v1366_v54 = vrot.slane %v1361_v57, %v3206_v21  ;;  %v1374_v58 = vrot.slane %v1361_v57, %v381_v22  ;;  %v1370_v59 = vrot.slane %v1361_v57, %v3203_v20  ;;  %v1742_v21 = vld [vmem:[%s3395_s17 + $0x8] sm:$0xff] }
 0x625   :  { %v1378_v60 = vrot.slane %v1361_v57, %v414_v24 }
 0x627   :  { %2353 = vmatpush3.bf16.msra.mxu1 %v2352_v6  ;;  %2385 = vmatpush3.bf16.msra.mxu0 %v2384_v5  ;;  %v1741_v6 = vld [vmem:[%s3395_s17] sm:$0xff] }
 0x628   :  { %2355 = vmatprep.subr.bf16.mxu1 %v2354_v9  ;;  %2387 = vmatprep.subr.bf16.mxu0 %v2386_v10  ;;  %v2403_v14 = vpack.c.bf16 %v1742_v21, %v1741_v6  ;;  %v1743_v9 = vld [vmem:[%s3395_s17 + $0x10] sm:$0xff]  ;;  %v1744_v10 = vld [vmem:[%s3395_s17 + $0x18] sm:$0xff] }
 0x629   :  { %v2406_v11 = vpack.c.bf16 %v1744_v10, %v1743_v9 }
 0x62b   :  { %2357 = vmatpush3.bf16.msra.mxu1 %v2356_v19  ;;  %2389 = vmatpush3.bf16.msra.mxu0 %v2388_v23  ;;  %v1749_v19 = vld [vmem:[%s3395_s17 + $0x40] sm:$0xff]  ;;  %v1750_v23 = vld [vmem:[%s3395_s17 + $0x48] sm:$0xff] }
 0x62c   :  { %2359 = vmatprep.subr.bf16.mxu1 %v2358_v28  ;;  %2391 = vmatprep.subr.bf16.mxu0 %v2390_v29  ;;  %v2415_v16 = vpack.c.bf16 %v1750_v23, %v1749_v19  ;;  %v1752_v28 = vld [vmem:[%s3395_s17 + $0x58] sm:$0xff] }
 0x62d   :  { %v2418_v29 = vpack.c.bf16 %v1752_v28, %v1751_v27 }
 0x62f   :  { %2361 = vmatpush3.bf16.msra.mxu1 %v2360_v34  ;;  %2393 = vmatpush3.bf16.msra.mxu0 %v2392_v56 }
 0x630   :  { %2363 = vmatprep.subr.bf16.mxu1 %v2362_v44  ;;  %2395 = vmatprep.subr.bf16.mxu0 %v2394_v35  ;;  %v1902_v44 = vld [vmem:[#allocation17] ss:$0 sm:$0xff] }
 0x633   :  { %2365 = vmatpush3.bf16.msra.mxu1 %v2364_v4  ;;  %2397 = vmatpush3.bf16.msra.mxu0 %v2396_v40  ;;  %v1903_v40 = vld [vmem:[#allocation18] ss:$0 sm:$0xff] }
 0x634   :  { %2367 = vmatprep.subr.bf16.mxu1 %v2366_v46  ;;  %2399 = vmatprep.subr.bf16.mxu0 %v2398_v1 }
 0x637   :  { %2369 = vmatpush3.bf16.msra.mxu1 %v2368_v50  ;;  %2401 = vmatpush3.bf16.msra.mxu0 %v2400_v55 }
 0x638   :  { %2402 = vmatprep.subr.bf16.mxu1 %v2741_v43 }
 0x6ed   :  { %v1449_v61 = vpop.f32.mrb[4].mxu1  ;;  %v1520_v62 = vpop.f32.mrb[18].mxu0 }
 0x6ee   :  { %v1450_v63 = vadd.f32 %v1449_v61, %v1366_v54  ;;  %v1521_v0 = vadd.f32 %v1520_v62, %v1374_v58  ;;  %v1451_v2 = vpop.f32.mrb[5].mxu1  ;;  %v1522_v3 = vpop.f32.mrb[19].mxu0 }
 0x6ef   :  { %v1452_v22 = vadd.f32 %v1451_v2, %v1370_v59  ;;  %v1523_v5 = vadd.f32 %v1522_v3, %v1378_v60 }
 0x6f0   :  { %v1525_v24 = vmax.f32 %v1450_v63, 0.0  ;;  %v1527_v8 = vmax.f32 %v1521_v0, 0.0 }
 0x6f1   :  { %v1526_v20 = vmax.f32 %v1452_v22, 0.0  ;;  %v1528_v7 = vmax.f32 %v1523_v5, 0.0 }
 0x6f3   :  { %1664 = vmatprep.mubr.f32.mxu1 %v1526_v20  ;;  %1734 = vmatprep.mubr.f32.mxu0 %v1528_v7 }
 0x6f4   :  { %1665 = vmatmul.mubr.f32.vlgmr.msra.gmra.mrb[6].mxu1 %v1525_v24  ;;  %1735 = vmatmul.mubr.f32.vlgmr.msra.gmra.mrb[20].mxu0 %v1527_v8 }
 0x6f5   :  { %2404 = vmatpush3.bf16.msra.mxu1 %v2403_v14  ;;  %2198 = vmatprep.mubr.msk.f32.mxu1 %vm2742_vm7, %v2743_v53  ;;  %v1748_v53 = vld [vmem:[%s3395_s17 + $0x38] sm:$0xff]  ;;  %s2745_s17 = smov [#allocation20]  }
 0x6f6   :  { %2405 = vmatprep.subr.bf16.mxu1 %v2741_v43  ;;  %v2412_v12 = vpack.c.bf16 %v1748_v53, %v1747_v18  ;;  %s1848_s4 = sshll.u32 %s2745_s17, 4  ;;  %s1849_s4 = int_to_ptr.vmem [resolvable:$true] %s1848_s4 }
 0x6f7   :  { %s2683_s18 = scalar_lea.vmem %s1849_s4, 32  ;;  %p2688_p11 = scmp.lt.s32.totalorder %s1849_s4, %s1849_s4 }
 0x6f8   :  { %p2684_p10 = scmp.ne.s32.totalorder %s1849_s4, %s2683_s18  ;;  %p2689_p12 = scmp.lt.s32.totalorder %s2683_s18, %s2683_s18 }
 0x6f9   :  { %2407 = vmatpush3.bf16.msra.mxu1 %v2406_v11 }
 0x6fa   :  { %2408 = vmatprep.subr.bf16.mxu1 %v2741_v43  ;;  %p2690_p13 = por %p2689_p12, %p2688_p11 }
 0x6fc   :  { %p2691_p0 = pnand %p2690_p13, %p2684_p10 }
 0x6fd   :  { %2410 = vmatpush3.bf16.msra.mxu1 %v2409_v17 }
 0x6fe   :  { %2411 = vmatprep.subr.bf16.mxu1 %v2741_v43 }
 0x701   :  { %2413 = vmatpush3.bf16.msra.mxu1 %v2412_v12 }
 0x702   :  { %2414 = vmatprep.subr.bf16.mxu1 %v2741_v43 }
 0x705   :  { %2416 = vmatpush3.bf16.msra.mxu1 %v2415_v16 }
 0x706   :  { %2417 = vmatprep.subr.bf16.mxu1 %v2741_v43 }
 0x709   :  { %2419 = vmatpush3.bf16.msra.mxu1 %v2418_v29 }
 0x70a   :  { %2420 = vmatprep.subr.bf16.mxu1 %v2741_v43 }
 0x70d   :  { %2422 = vmatpush3.bf16.msra.mxu1 %v2421_v32 }
 0x70e   :  { %2423 = vmatprep.subr.bf16.mxu1 %v2741_v43 }
 0x711   :  { %2425 = vmatpush3.bf16.msra.mxu1 %v2424_v26 }
 0x7c7   :  { %v1996_v34 = vpop.f32.mrb[6].mxu1  ;;  %v2031_v56 = vpop.f32.mrb[20].mxu0 }
 0x7c8   :  { %v1997_v35 = vpop.f32.mrb[7].mxu1  ;;  %v2032_v36 = vpop.f32.mrb[21].mxu0 }
 0x7c9   :  { %v1998_v37 = vadd.f32 %v1997_v35, %v1996_v34  ;;  %v2033_v38 = vadd.f32 %v2032_v36, %v2031_v56 }
 0x7cb   :  { %v1667_v4 = vadd.f32 %v1998_v37, %v1902_v44 }
 0x7cd   :  { %v1737_v39 = vadd.f32 %v2033_v38, %v1667_v4 }
 0x7cf   :  { %v1740_v43 = vmax.f32 %v1737_v39, 0.0 }
 0x7d1   :  { %2199 = vmatmul.mubr.f32.vlgmr.msra.gmra.mrb[8].mxu1 %v1740_v43 }
 0x8a4   :  { %v1830_v41 = vpop.f32.mrb[8].mxu1 }
 0x8a5   :  { %v1831_v42 = vadd.f32 %v1903_v40, %v1830_v41  ;;  %v2200_v45 = vpop.f32.mrb[9].mxu1 }
 0x8a7   :  { %1837 = vrot.lane.b32.xlu1 %v1831_v42, %s2744_s27 }
 0x919   :  { %v1838_v46 = vpop.permute.xlu1 %1837 }
 0x91a   :  { %1841 = vst.msk [vmem:[#allocation20] sm:$0x3] %vm1840_vm4, %v1838_v46 }
 0x91b   :  { %2694 = shalt.err (!%p2691_p0)
}
 0x91c   :  { %s2695_s13 = scalar_lea.hbm %s3397_s19, 32 }
 0x91d   :  { %p2696_p1 = scmp.ne.s32.totalorder %s3397_s19, %s2695_s13  ;;  %p2699_p2 = scmp.lt.u32.totalorder %s2695_s13, %s3397_s19 }
 0x91f   :  { %p2701_p3 = pnand %p2699_p2, %p2696_p1 }
 0x921   :  { %2704 = shalt.err (!%p2701_p3)
}
 0x922   :  { %1851 = dma.vmem_to_hbm [thread:$0]  %s1849_s4, 32, %s3397_s19, [#allocation5]  }
 0x923   :  { %2717 = dma.done.wait [#allocation5], 32  }
 0x924   :  { %2718 = vsyncadd [#allocation5], 4294967264 }
 0x925   :  { %1855 = vsyncpa [#allocation4], 1 }
 0x926   :  { %1856 = vsyncpa [#allocation7], 1 }
 0x927   :  { %1857 = vsyncpa [#allocation10], 1 }
 0x928   :  { %1858 = vsyncpa [#allocation13], 1 }
 0x929   :  { %1859 = vsyncpa [#allocation16], 1 }
 0x92a   :  { %1860 = vsyncpa [#allocation19], 1 }
 0x92b   :  { %1861 = vsyncpa [#allocation5], 1 }

</bundles_post_ra>
